<compile_context>
chip_gen: v7x
topology: tpu7x:2x2x1
jax: 0.10.0
libtpu: 0.0.40
codegen_flags: <defaults>
</compile_context>

<pallas_src>
import functools

import jax
import jax.numpy as jnp
from jax.experimental import pallas as pl
from jax.experimental.pallas import tpu as pltpu


NEG_INF = -1e30  # large finite negative: avoids inf-inf / 0*inf NaN hazards


# ----------------------------------------------------------------------------
# in-kernel helpers
# ----------------------------------------------------------------------------
def _recip(x):
    # EUP approx reciprocal + one Newton step -> ~f32 accurate, VALU-cheap
    r = pl.reciprocal(x, approx=True)
    return r * (2.0 - x * r)


def _erf(x):
    # Abramowitz & Stegun 7.1.26 rational approximation (float32-accurate).
    a1, a2, a3, a4, a5 = 0.254829592, -0.284496736, 1.421413741, -1.453152027, 1.061405429
    p = 0.3275911
    s = jnp.where(x >= 0.0, 1.0, -1.0)
    ax = jnp.abs(x)
    t = pl.reciprocal(1.0 + p * ax, approx=True)   # poly error dominates anyway
    poly = ((((a5 * t + a4) * t + a3) * t + a2) * t + a1) * t
    return s * (1.0 - poly * jnp.exp(-ax * ax))


def _gelu_exact(x):
    # matches torch.nn.functional.gelu (erf formulation), f32 math
    return 0.5 * x * (1.0 + _erf(x * 0.7071067811865476))


def _softmax_lastdim(x):
    m = jnp.max(x, axis=-1, keepdims=True)
    e = jnp.exp(x - m)
    return e * _recip(jnp.sum(e, axis=-1, keepdims=True))


# ----------------------------------------------------------------------------
# fused layer-stack kernel: all ResidualSelfAttention blocks in one pallas_call
# grid = (batch_blocks [parallel], n_layers [arbitrary])
# ----------------------------------------------------------------------------
def stack_kernel(x_ref, small_ref, b1_ref, wk_ref, wv_ref, w1_ref, w2_ref,
                 o_ref, act_ref, *, n_heads, use_fc):
    li = pl.program_id(1)
    n_layers = pl.num_programs(1)
    bb, T, C = x_ref.shape
    H = n_heads
    dh = C // H
    rows = bb * T

    # layer 0: fused input softmax of (tok_embd + pos_embd); the residual stream
    # then lives in VMEM (act_ref) across the whole layer axis.
    @pl.when(li == 0)
    def _():
        act_ref[...] = _softmax_lastdim(x_ref[...])

    x = act_ref[...].reshape(rows, C)

    # packed per-layer small params: rows = [ln_g, ln_b, b_key, b_val, b_fc2, pad..]
    g, beta = small_ref[0], small_ref[1]
    bk, bv, b2 = small_ref[2], small_ref[3], small_ref[4]

    # LayerNorm (eps = 1e-5, elementwise affine)
    mu = jnp.mean(x, axis=-1, keepdims=True)
    xc = x - mu
    var = jnp.mean(xc * xc, axis=-1, keepdims=True)
    y = xc * jax.lax.rsqrt(var + 1e-5) * g + beta

    # key/value projections (bf16 MXU inputs, f32 accumulation); query = Identity
    yb = y.astype(jnp.bfloat16)
    key = jnp.dot(yb, wk_ref[...], preferred_element_type=jnp.float32) + bk
    val = jnp.dot(yb, wv_ref[...], preferred_element_type=jnp.float32) + bv

    # one head-split relayout per tensor: (rows, C) -> (H*bb, T, dh)
    def heads(a):
        p = jnp.stack([a[:, h * dh:(h + 1) * dh] for h in range(H)], axis=0)
        p = p.reshape(H, bb, T, dh)          # split sublane dim rows -> (bb, T)
        return p.reshape(H * bb, T, dh).astype(jnp.bfloat16)

    kh, qh, vh = heads(key), heads(y), heads(val)

    # causal mask built in-kernel (VPU iota/compare hides under the MXU)
    r = jax.lax.broadcasted_iota(jnp.int32, (T, T), 0)
    c = jax.lax.broadcasted_iota(jnp.int32, (T, T), 1)
    neg = jnp.where(c <= r, 0.0, NEG_INF).astype(jnp.float32)

    # logits[g,t,s] = key[g,t,:] . query[g,s,:]   (no 1/sqrt(dh), as in the module)
    logits = jnp.einsum('gtd,gsd->gts', kh, qh,
                        preferred_element_type=jnp.float32) + neg
    m = jnp.max(logits, axis=-1, keepdims=True)
    p = jnp.exp(logits - m)
    att = p * _recip(jnp.sum(p, axis=-1, keepdims=True))
    yo = jnp.einsum('gts,gsd->gtd', att.astype(jnp.bfloat16), vh,
                    preferred_element_type=jnp.float32)        # (H*bb, T, dh)

    # merge heads back into the channel dim: (H*bb, T, dh) -> (rows, C)
    yo = yo.reshape(H, bb, T, dh).reshape(H, rows, dh)
    att_out = jnp.concatenate([yo[h] for h in range(H)], axis=-1)

    if use_fc:
        b1 = b1_ref[...]                                       # (1, 2C)
        h1 = jnp.dot(att_out.astype(jnp.bfloat16), w1_ref[...],
                     preferred_element_type=jnp.float32) + b1
        h1 = _gelu_exact(h1)
        att_out = jnp.dot(h1.astype(jnp.bfloat16), w2_ref[...],
                          preferred_element_type=jnp.float32) + b2

    act_ref[...] = (x + att_out).reshape(bb, T, C)             # residual

    @pl.when(li == n_layers - 1)
    def _():
        o_ref[...] = act_ref[...]

    # TODO(synk): flash-style key-axis tiling (online softmax) would be needed for
    # large context_length so the (H*bb, T, T) scores never materialize at once.


# ----------------------------------------------------------------------------
# fused head + cross-entropy kernel (vocab tiled & padded, online lse/argmax):
# the [B, T, V] logits never leave VMEM.
# ----------------------------------------------------------------------------
def head_ce_kernel(f_ref, tgt_ref, w_ref, b_ref, lse_ref, pick_ref, pred_ref,
                   xb_sc, m_sc, l_sc, bestv_sc, besti_sc, pick_sc,
                   *, v_blk, v_real, v_pad):
    vi = pl.program_id(1)
    nv = pl.num_programs(1)
    bb, T, C = f_ref.shape

    @pl.when(vi == 0)
    def _():
        # cast features to bf16 ONCE per batch block (not once per vocab tile)
        xb_sc[...] = f_ref[...].reshape(bb * T, C).astype(jnp.bfloat16)
        m_sc[...] = jnp.full_like(m_sc, NEG_INF)
        l_sc[...] = jnp.zeros_like(l_sc)
        bestv_sc[...] = jnp.full_like(bestv_sc, NEG_INF)
        besti_sc[...] = jnp.zeros_like(besti_sc)
        pick_sc[...] = jnp.zeros_like(pick_sc)

    logits = (jnp.dot(xb_sc[...], w_ref[...], preferred_element_type=jnp.float32)
              + b_ref[0]).reshape(bb, T, v_blk)
    col = jax.lax.broadcasted_iota(jnp.int32, (bb, T, v_blk), 2) + vi * v_blk
    if v_pad != v_real:                       # static: mask padded vocab columns
        logits = jnp.where(col < v_real, logits, NEG_INF)

    # online logsumexp over vocab tiles (running stats kept in (bb, T, 1) sublane
    # layout so they broadcast against the logits tile without per-tile relayouts)
    blk_max = jnp.max(logits, axis=-1, keepdims=True)
    m_prev = m_sc[...]
    m_new = jnp.maximum(m_prev, blk_max)
    l_sc[...] = jnp.exp(m_prev - m_new) * l_sc[...] + \
        jnp.sum(jnp.exp(logits - m_new), axis=-1, keepdims=True)
    m_sc[...] = m_new

    # online argmax (first-occurrence tie-break); indices tracked as f32 (V < 2^24)
    is_max = logits == blk_max
    blk_arg = jnp.min(jnp.where(is_max, col.astype(jnp.float32), 3.0e9),
                      axis=-1, keepdims=True)
    better = blk_max > bestv_sc[...]
    bestv_sc[...] = jnp.where(better, blk_max, bestv_sc[...])
    besti_sc[...] = jnp.where(better, blk_arg, besti_sc[...])

    # logit at the target column (target == -100 matches nothing -> contributes 0)
    hit = col == tgt_ref[...]
    pick_sc[...] = pick_sc[...] + jnp.sum(jnp.where(hit, logits, 0.0),
                                          axis=-1, keepdims=True)

    @pl.when(vi == nv - 1)
    def _():
        # lane-dense (bb, 1, T) outputs: T maps to lanes for the final stores
        lse_ref[...] = jnp.swapaxes(m_sc[...] + jnp.log(l_sc[...]), 1, 2)
        pick_ref[...] = jnp.swapaxes(pick_sc[...], 1, 2)
        pred_ref[...] = jnp.swapaxes(besti_sc[...], 1, 2).astype(jnp.int32)


# ----------------------------------------------------------------------------
# generation-aware sizing helpers
# ----------------------------------------------------------------------------
def _tpu_vmem_bytes():
    try:
        return int(pltpu.get_tpu_info().vmem_capacity_bytes)
    except Exception:
        try:
            kind = jax.devices()[0].device_kind.lower()
        except Exception:
            kind = ""
        return (64 if "v7" in kind else 128) * 2 ** 20


def _num_tensorcores():
    try:
        kind = jax.devices()[0].device_kind.lower()
    except Exception:
        return 1
    return 2 if any(t in kind for t in ("v7", "v4", "v5p")) else 1


def _pick_batch_block(B, T, C, H, use_fc, vmem_budget):
    """Largest batch block whose estimated VMEM footprint (activations, per-layer
    weights x2 buffers, attention scores, FC intermediate) fits the budget.
    On multi-TensorCore chips keep >= 2 grid steps along the batch axis."""
    wbytes = 2 * (6 * C * C * 2 + (8 * C + 2 * C) * 4)       # double-buffered layer weights

    def est(bb):
        rows = bb * T
        act = 4 * bb * T * C * 4                             # in/out blocks + scratch
        scores = 3 * bb * H * T * T * 4                      # logits + softmax temps
        inter = 8 * rows * C * 4 + (3 * rows * 2 * C * 4 if use_fc else 0)
        return wbytes + act + scores + inter

    fits = [d for d in range(1, B + 1) if B % d == 0 and est(d) <= vmem_budget] or [1]
    bb = max(fits)
    if _num_tensorcores() >= 2 and B >= 2 and bb == B:
        bb = max([d for d in fits if d <= B // 2] or [bb])
    return bb


# ----------------------------------------------------------------------------
# pallas_call wrappers
# ----------------------------------------------------------------------------
def run_stack(x0, sp, n_heads, use_fc, b_blk, vmem_limit):
    B, T, C = x0.shape
    L = sp["wk"].shape[0]
    kernel = functools.partial(stack_kernel, n_heads=n_heads, use_fc=use_fc)
    bmap = lambda bi, li: (bi, 0, 0)
    lmap = lambda bi, li: (li, 0, 0)
    # NOTE: x0 / output are grid-invariant along the layer axis; on v7x
    # pipeline_mode=pl.Buffered(1) on those specs would drop their second buffer.
    return pl.pallas_call(
        kernel,
        out_shape=jax.ShapeDtypeStruct((B, T, C), jnp.float32),
        grid=(B // b_blk, L),
        in_specs=[
            pl.BlockSpec((b_blk, T, C), bmap),          # tok_embd + pos_embd
            pl.BlockSpec((None, 8, C), lmap),           # packed ln/bias params (f32)
            pl.BlockSpec((None, 1, 2 * C), lmap),       # b_fc1
            pl.BlockSpec((None, C, C), lmap),           # W_key   [in, out] (bf16)
            pl.BlockSpec((None, C, C), lmap),           # W_value [in, out] (bf16)
            pl.BlockSpec((None, C, 2 * C), lmap),       # W_fc1             (bf16)
            pl.BlockSpec((None, 2 * C, C), lmap),       # W_fc2             (bf16)
        ],
        out_specs=pl.BlockSpec((b_blk, T, C), bmap),
        scratch_shapes=[pltpu.VMEM((b_blk, T, C), jnp.float32)],   # residual stream
        compiler_params=pltpu.CompilerParams(
            dimension_semantics=("parallel", "arbitrary"),
            vmem_limit_bytes=vmem_limit),
    )(x0, sp["small"], sp["b1"], sp["wk"], sp["wv"], sp["w1"], sp["w2"])


def run_head_ce(features, targets, head_w, head_b, b_blk, vmem_limit):
    B, T, C = features.shape
    V = head_w.shape[1]
    assert V < (1 << 24), "f32 online-argmax index requires vocab < 2^24"
    # pad the vocab to a multiple of the (128-aligned) tile so it always tiles
    v_blk = min(2048, ((V + 127) // 128) * 128)
    Vp = ((V + v_blk - 1) // v_blk) * v_blk
    if Vp != V:
        head_w = jnp.pad(head_w, ((0, 0), (0, Vp - V)))
        head_b = jnp.pad(head_b, ((0, 0), (0, Vp - V)))
    kernel = functools.partial(head_ce_kernel, v_blk=v_blk, v_real=V, v_pad=Vp)
    bmap = lambda bi, vi: (bi, 0, 0)
    lse, picked, pred = pl.pallas_call(
        kernel,
        out_shape=(jax.ShapeDtypeStruct((B, 1, T), jnp.float32),   # logsumexp
                   jax.ShapeDtypeStruct((B, 1, T), jnp.float32),   # logit@target
                   jax.ShapeDtypeStruct((B, 1, T), jnp.int32)),    # argmax
        grid=(B // b_blk, Vp // v_blk),
        in_specs=[
            pl.BlockSpec((b_blk, T, C), bmap),                     # features
            pl.BlockSpec((b_blk, T, 1), bmap),                     # targets
            pl.BlockSpec((C, v_blk), lambda bi, vi: (0, vi)),      # head W (bf16)
            pl.BlockSpec((1, v_blk), lambda bi, vi: (0, vi)),      # head b
        ],
        out_specs=(pl.BlockSpec((b_blk, 1, T), bmap),
                   pl.BlockSpec((b_blk, 1, T), bmap),
                   pl.BlockSpec((b_blk, 1, T), bmap)),
        scratch_shapes=[pltpu.VMEM((b_blk * T, C), jnp.bfloat16),  # bf16 features (cast once)
                        pltpu.VMEM((b_blk, T, 1), jnp.float32),    # running max
                        pltpu.VMEM((b_blk, T, 1), jnp.float32),    # running sum-exp
                        pltpu.VMEM((b_blk, T, 1), jnp.float32),    # best logit
                        pltpu.VMEM((b_blk, T, 1), jnp.float32),    # best index (f32)
                        pltpu.VMEM((b_blk, T, 1), jnp.float32)],   # logit at target
        compiler_params=pltpu.CompilerParams(
            dimension_semantics=("parallel", "arbitrary"),
            vmem_limit_bytes=vmem_limit),
    )(features, targets[:, :, None].astype(jnp.int32),
      head_w.astype(jnp.bfloat16), head_b)
    return lse[:, 0, :], picked[:, 0, :], pred[:, 0, :]


# ----------------------------------------------------------------------------
# parameter init (mimics torch defaults; head zeroed, pos_embeddings zero,
# LayerNorm affine = 1/0).  MXU weights stored bf16; per-layer params stacked
# along a leading [L] axis for the fused layer grid.
# ----------------------------------------------------------------------------
def init_params(key, cfg):
    C, V, L, ctx = cfg["embedding_dim"], cfg["vocab_size"], cfg["n_layers"], cfg["context_length"]

    def uni(k, shape, fan_in):
        bound = 1.0 / float(fan_in) ** 0.5
        return jax.random.uniform(k, shape, jnp.float32, -bound, bound)

    keys = jax.random.split(key, 9)
    tok_emb = jax.random.normal(keys[0], (V, C), jnp.float32)   # nn.Embedding N(0,1)

    wk = uni(keys[1], (L, C, C), C).astype(jnp.bfloat16)
    wv = uni(keys[2], (L, C, C), C).astype(jnp.bfloat16)
    w1 = uni(keys[3], (L, C, 2 * C), C).astype(jnp.bfloat16)
    w2 = uni(keys[4], (L, 2 * C, C), 2 * C).astype(jnp.bfloat16)
    # packed small params per layer: rows [ln_g, ln_b, b_key, b_val, b_fc2, pad x3]
    small = jnp.zeros((L, 8, C), jnp.float32)
    small = small.at[:, 0, :].set(1.0)
    small = small.at[:, 2, :].set(uni(keys[5], (L, C), C))
    small = small.at[:, 3, :].set(uni(keys[6], (L, C), C))
    small = small.at[:, 4, :].set(uni(keys[7], (L, C), 2 * C))
    b1 = uni(keys[8], (L, 1, 2 * C), C)

    # TODO(synk): condnorm.DiagNorm and the `scaling` parameter are constructed in
    # __init__ but never used in forward(), so they are omitted here.
    # NOTE: padding C up to a 128/256 multiple (with masked LN/softmax reductions)
    # would further improve MXU/lane utilization; kept at native dims here.
    return dict(
        tok_emb=tok_emb,
        pos_emb=jnp.zeros((1, ctx, C), jnp.float32),
        head_w=jnp.zeros((C, V), jnp.bfloat16),    # head weight/bias zeroed in __init__
        head_b=jnp.zeros((1, V), jnp.float32),
        stack=dict(small=small, b1=b1, wk=wk, wv=wv, w1=w1, w2=w2),
    )


# ----------------------------------------------------------------------------
# full forward (matches StackedAttention.forward)
# ----------------------------------------------------------------------------
def stacked_attention_forward(idx, mask, labels, params, cfg, compute_loss=True):
    del mask  # `mask` is an argument of the PyTorch forward but is unused there
    B, T_full = idx.shape
    T = min(T_full - 1, cfg["context_length"])
    C = cfg["embedding_dim"]
    H = cfg["n_heads"]
    L = cfg["n_layers"]
    assert C % H == 0

    vmem_cap = _tpu_vmem_bytes()
    vmem_limit = int(vmem_cap * 0.75)
    b_blk = _pick_batch_block(B, T, C, H, cfg["use_fc"],
                              vmem_budget=int(vmem_cap * 0.5))

    tok = jnp.take(params["tok_emb"], idx[:, :T], axis=0)        # [B, T, C]
    x0 = tok + params["pos_emb"][:, :T, :]

    if L == 0:
        features = jax.nn.softmax(x0, axis=-1)   # degenerate: nothing to fuse into
    else:
        features = run_stack(x0, params["stack"], H, cfg["use_fc"], b_blk, vmem_limit)
    if not compute_loss:
        return features

    targets = labels[:, :T].astype(jnp.int32)
    lse, picked, pred = run_head_ce(features, targets, params["head_w"],
                                    params["head_b"], b_blk, vmem_limit)

    t_flat = targets.reshape(-1)
    lse_f, pick_f, pred_f = lse.reshape(-1), picked.reshape(-1), pred.reshape(-1)
    valid = t_flat != -100
    num_targets = jnp.sum(valid)
    num_correct = jnp.sum(jnp.where(valid, t_flat == pred_f, False))
    denom = jnp.maximum(num_targets, 1)           # guard: all-ignored batch
    accuracy = num_correct / denom

    # F.cross_entropy (ignore_index=-100, mean reduction) from fused per-row stats
    loss = jnp.sum(jnp.where(valid, lse_f - pick_f, 0.0)) / denom
    return features, loss, accuracy


# ----------------------------------------------------------------------------
if __name__ == "__main__":
    cfg = dict(embedding_dim=32, n_heads=4, context_length=8,
               vocab_size=32, n_layers=2, use_fc=True)

    key = jax.random.PRNGKey(0)
    k_param, k_idx, k_lab = jax.random.split(key, 3)

    B, T_seq = 2, 9                               # T = min(9 - 1, 8) = 8
    idx = jax.random.randint(k_idx, (B, T_seq), 0, cfg["vocab_size"], dtype=jnp.int32)
    labels = jax.random.randint(k_lab, (B, T_seq), 0, cfg["vocab_size"], dtype=jnp.int32)
    labels = labels.at[0, 2].set(-100)            # exercise ignore_index path
    mask = jnp.ones((B, T_seq), dtype=jnp.int32)

    params = init_params(k_param, cfg)

    features, loss, accuracy = stacked_attention_forward(idx, mask, labels, params, cfg)
    jax.block_until_ready((features, loss, accuracy))
    print("KERNEL_OK")
</pallas_src>

<mosaic_0001>
module attributes {stable_mosaic.version = 11 : i64} {
  func.func @stack_kernel(%arg0: i32, %arg1: i32, %arg2: memref<2x8x32xf32, #tpu.memory_space<vmem>>, %arg3: memref<1x8x32xf32, #tpu.memory_space<vmem>>, %arg4: memref<1x1x64xf32, #tpu.memory_space<vmem>>, %arg5: memref<1x32x32xbf16, #tpu.memory_space<vmem>>, %arg6: memref<1x32x32xbf16, #tpu.memory_space<vmem>>, %arg7: memref<1x32x64xbf16, #tpu.memory_space<vmem>>, %arg8: memref<1x64x32xbf16, #tpu.memory_space<vmem>>, %arg9: memref<2x8x32xf32, #tpu.memory_space<vmem>>, %arg10: memref<2x8x32xf32, #tpu.memory_space<vmem>>) attributes {dimension_semantics = [#tpu.dimension_semantics<parallel>, #tpu.dimension_semantics<arbitrary>], iteration_bounds = array<i64: 1, 2>, scalar_prefetch = 0 : i64, scratch_operands = 1 : i64, tpu.core_type = #tpu.core_type<tc>, window_params = [{transform_indices = @transform_0, window_bounds = array<i64: 2, 8, 32>}, {transform_indices = @transform_1, window_bounds = array<i64: 1, 8, 32>}, {transform_indices = @transform_2, window_bounds = array<i64: 1, 1, 64>}, {transform_indices = @transform_3, window_bounds = array<i64: 1, 32, 32>}, {transform_indices = @transform_4, window_bounds = array<i64: 1, 32, 32>}, {transform_indices = @transform_5, window_bounds = array<i64: 1, 32, 64>}, {transform_indices = @transform_6, window_bounds = array<i64: 1, 64, 32>}, {transform_indices = @transform_7, window_bounds = array<i64: 2, 8, 32>}]} {
    %c0_i32 = arith.constant 0 : i32
    %0 = arith.cmpi eq, %arg1, %c0_i32 : i32
    %1 = arith.extui %0 : i1 to i32
    %c0_i32_0 = arith.constant 0 : i32
    %2 = arith.cmpi ne, %1, %c0_i32_0 : i32
    scf.if %2 {
      %c0_63 = arith.constant 0 : index
      %c0_64 = arith.constant 0 : index
      %c0_65 = arith.constant 0 : index
      %184 = vector.load %arg2[%c0_63, %c0_64, %c0_65] : memref<2x8x32xf32, #tpu.memory_space<vmem>>, vector<2x8x32xf32>
      %cst_66 = arith.constant dense<0xFF800000> : vector<2x8xf32>
      %185 = vector.multi_reduction <maximumf>, %184, %cst_66 [2] : vector<2x8x32xf32> to vector<2x8xf32>
      %186 = vector.shape_cast %185 : vector<2x8xf32> to vector<2x8x1xf32>
      %187 = vector.broadcast %186 : vector<2x8x1xf32> to vector<2x8x32xf32>
      %188 = arith.subf %184, %187 : vector<2x8x32xf32>
      %189 = math.exp %188 : vector<2x8x32xf32>
      %cst_67 = arith.constant dense<0.000000e+00> : vector<2x8xf32>
      %190 = vector.multi_reduction <add>, %189, %cst_67 [2] : vector<2x8x32xf32> to vector<2x8xf32>
      %191 = vector.shape_cast %190 : vector<2x8xf32> to vector<2x8x1xf32>
      %192 = tpu.reciprocal %191 {approx = true} : vector<2x8x1xf32> -> vector<2x8x1xf32>
      %193 = arith.mulf %191, %192 : vector<2x8x1xf32>
      %cst_68 = arith.constant 2.000000e+00 : f32
      %194 = vector.broadcast %cst_68 : f32 to vector<2x8x1xf32>
      %195 = arith.subf %194, %193 : vector<2x8x1xf32>
      %196 = arith.mulf %192, %195 : vector<2x8x1xf32>
      %197 = vector.broadcast %196 : vector<2x8x1xf32> to vector<2x8x32xf32>
      %198 = arith.mulf %189, %197 : vector<2x8x32xf32>
      %c0_69 = arith.constant 0 : index
      %c0_70 = arith.constant 0 : index
      %c0_71 = arith.constant 0 : index
      %199 = vector.load %arg10[%c0_69, %c0_70, %c0_71] : memref<2x8x32xf32, #tpu.memory_space<vmem>>, vector<2x8x32xf32>
      tpu.vector_store %arg10[%c0_69, %c0_70, %c0_71], %198 {strides = array<i32>} : memref<2x8x32xf32, #tpu.memory_space<vmem>>, vector<2x8x32xf32>,
    } else {
    }
    %c0 = arith.constant 0 : index
    %c0_1 = arith.constant 0 : index
    %c0_2 = arith.constant 0 : index
    %3 = vector.load %arg10[%c0, %c0_1, %c0_2] : memref<2x8x32xf32, #tpu.memory_space<vmem>>, vector<2x8x32xf32>
    %4 = vector.shape_cast %3 : vector<2x8x32xf32> to vector<16x32xf32>
    %c0_3 = arith.constant 0 : index
    %c0_4 = arith.constant 0 : index
    %c0_5 = arith.constant 0 : index
    %5 = vector.load %arg3[%c0_3, %c0_4, %c0_5] : memref<1x8x32xf32, #tpu.memory_space<vmem>>, vector<1x1x32xf32>
    %6 = vector.shape_cast %5 : vector<1x1x32xf32> to vector<32xf32>
    %c0_6 = arith.constant 0 : index
    %c1 = arith.constant 1 : index
    %c0_7 = arith.constant 0 : index
    %7 = vector.load %arg3[%c0_6, %c1, %c0_7] : memref<1x8x32xf32, #tpu.memory_space<vmem>>, vector<1x1x32xf32>
    %8 = vector.shape_cast %7 : vector<1x1x32xf32> to vector<32xf32>
    %c0_8 = arith.constant 0 : index
    %c2 = arith.constant 2 : index
    %c0_9 = arith.constant 0 : index
    %9 = vector.load %arg3[%c0_8, %c2, %c0_9] : memref<1x8x32xf32, #tpu.memory_space<vmem>>, vector<1x1x32xf32>
    %10 = vector.shape_cast %9 : vector<1x1x32xf32> to vector<32xf32>
    %c0_10 = arith.constant 0 : index
    %c3 = arith.constant 3 : index
    %c0_11 = arith.constant 0 : index
    %11 = vector.load %arg3[%c0_10, %c3, %c0_11] : memref<1x8x32xf32, #tpu.memory_space<vmem>>, vector<1x1x32xf32>
    %12 = vector.shape_cast %11 : vector<1x1x32xf32> to vector<32xf32>
    %c0_12 = arith.constant 0 : index
    %c4 = arith.constant 4 : index
    %c0_13 = arith.constant 0 : index
    %13 = vector.load %arg3[%c0_12, %c4, %c0_13] : memref<1x8x32xf32, #tpu.memory_space<vmem>>, vector<1x1x32xf32>
    %14 = vector.shape_cast %13 : vector<1x1x32xf32> to vector<32xf32>
    %cst = arith.constant dense<0.000000e+00> : vector<16xf32>
    %15 = vector.multi_reduction <add>, %4, %cst [1] : vector<16x32xf32> to vector<16xf32>
    %16 = vector.shape_cast %15 : vector<16xf32> to vector<16x1xf32>
    %cst_14 = arith.constant 3.200000e+01 : f32
    %17 = vector.broadcast %cst_14 : f32 to vector<16x1xf32>
    %18 = arith.divf %16, %17 : vector<16x1xf32>
    %19 = vector.broadcast %18 : vector<16x1xf32> to vector<16x32xf32>
    %20 = arith.subf %4, %19 : vector<16x32xf32>
    %21 = arith.mulf %20, %20 : vector<16x32xf32>
    %cst_15 = arith.constant dense<0.000000e+00> : vector<16xf32>
    %22 = vector.multi_reduction <add>, %21, %cst_15 [1] : vector<16x32xf32> to vector<16xf32>
    %23 = vector.shape_cast %22 : vector<16xf32> to vector<16x1xf32>
    %cst_16 = arith.constant 3.200000e+01 : f32
    %24 = vector.broadcast %cst_16 : f32 to vector<16x1xf32>
    %25 = arith.divf %23, %24 : vector<16x1xf32>
    %cst_17 = arith.constant 9.99999974E-6 : f32
    %26 = vector.broadcast %cst_17 : f32 to vector<16x1xf32>
    %27 = arith.addf %25, %26 : vector<16x1xf32>
    %28 = math.rsqrt %27 : vector<16x1xf32>
    %29 = vector.broadcast %28 : vector<16x1xf32> to vector<16x32xf32>
    %30 = arith.mulf %20, %29 : vector<16x32xf32>
    %31 = vector.shape_cast %6 : vector<32xf32> to vector<1x32xf32>
    %32 = vector.broadcast %31 : vector<1x32xf32> to vector<16x32xf32>
    %33 = arith.mulf %30, %32 : vector<16x32xf32>
    %34 = vector.shape_cast %8 : vector<32xf32> to vector<1x32xf32>
    %35 = vector.broadcast %34 : vector<1x32xf32> to vector<16x32xf32>
    %36 = arith.addf %33, %35 : vector<16x32xf32>
    %37 = arith.truncf %36 : vector<16x32xf32> to vector<16x32xbf16>
    %c0_18 = arith.constant 0 : index
    %c0_19 = arith.constant 0 : index
    %c0_20 = arith.constant 0 : index
    %38 = vector.load %arg5[%c0_18, %c0_19, %c0_20] : memref<1x32x32xbf16, #tpu.memory_space<vmem>>, vector<1x32x32xbf16>
    %39 = vector.shape_cast %38 : vector<1x32x32xbf16> to vector<32x32xbf16>
    %cst_21 = arith.constant dense<0.000000e+00> : vector<16x32xf32>
    %40 = tpu.matmul %37, %39, %cst_21 {dimension_numbers = #tpu.dot_dimension_numbers<[1], [0], [0], [1], [0, 0, 1, 1], [], []>} : vector<16x32xbf16>, vector<32x32xbf16>, vector<16x32xf32> -> vector<16x32xf32>
    %41 = vector.shape_cast %10 : vector<32xf32> to vector<1x32xf32>
    %42 = vector.broadcast %41 : vector<1x32xf32> to vector<16x32xf32>
    %43 = arith.addf %40, %42 : vector<16x32xf32>
    %c0_22 = arith.constant 0 : index
    %c0_23 = arith.constant 0 : index
    %c0_24 = arith.constant 0 : index
    %44 = vector.load %arg6[%c0_22, %c0_23, %c0_24] : memref<1x32x32xbf16, #tpu.memory_space<vmem>>, vector<1x32x32xbf16>
    %45 = vector.shape_cast %44 : vector<1x32x32xbf16> to vector<32x32xbf16>
    %cst_25 = arith.constant dense<0.000000e+00> : vector<16x32xf32>
    %46 = tpu.matmul %37, %45, %cst_25 {dimension_numbers = #tpu.dot_dimension_numbers<[1], [0], [0], [1], [0, 0, 1, 1], [], []>} : vector<16x32xbf16>, vector<32x32xbf16>, vector<16x32xf32> -> vector<16x32xf32>
    %47 = vector.shape_cast %12 : vector<32xf32> to vector<1x32xf32>
    %48 = vector.broadcast %47 : vector<1x32xf32> to vector<16x32xf32>
    %49 = arith.addf %46, %48 : vector<16x32xf32>
    %50 = vector.extract_strided_slice %43 {offsets = [0, 0], sizes = [16, 8], strides = [1, 1]} : vector<16x32xf32> to vector<16x8xf32>
    %51 = vector.extract_strided_slice %43 {offsets = [0, 8], sizes = [16, 8], strides = [1, 1]} : vector<16x32xf32> to vector<16x8xf32>
    %52 = vector.extract_strided_slice %43 {offsets = [0, 16], sizes = [16, 8], strides = [1, 1]} : vector<16x32xf32> to vector<16x8xf32>
    %53 = vector.extract_strided_slice %43 {offsets = [0, 24], sizes = [16, 8], strides = [1, 1]} : vector<16x32xf32> to vector<16x8xf32>
    %54 = vector.shape_cast %50 : vector<16x8xf32> to vector<1x16x8xf32>
    %55 = vector.shape_cast %51 : vector<16x8xf32> to vector<1x16x8xf32>
    %56 = vector.shape_cast %52 : vector<16x8xf32> to vector<1x16x8xf32>
    %57 = vector.shape_cast %53 : vector<16x8xf32> to vector<1x16x8xf32>
    %58 = tpu.concatenate %54, %55, %56, %57 in 0 : vector<1x16x8xf32>, vector<1x16x8xf32>, vector<1x16x8xf32>, vector<1x16x8xf32> -> vector<4x16x8xf32>
    %59 = vector.shape_cast %58 : vector<4x16x8xf32> to vector<4x2x8x8xf32>
    %60 = vector.shape_cast %59 : vector<4x2x8x8xf32> to vector<8x8x8xf32>
    %61 = arith.truncf %60 : vector<8x8x8xf32> to vector<8x8x8xbf16>
    %62 = vector.extract_strided_slice %36 {offsets = [0, 0], sizes = [16, 8], strides = [1, 1]} : vector<16x32xf32> to vector<16x8xf32>
    %63 = vector.extract_strided_slice %36 {offsets = [0, 8], sizes = [16, 8], strides = [1, 1]} : vector<16x32xf32> to vector<16x8xf32>
    %64 = vector.extract_strided_slice %36 {offsets = [0, 16], sizes = [16, 8], strides = [1, 1]} : vector<16x32xf32> to vector<16x8xf32>
    %65 = vector.extract_strided_slice %36 {offsets = [0, 24], sizes = [16, 8], strides = [1, 1]} : vector<16x32xf32> to vector<16x8xf32>
    %66 = vector.shape_cast %62 : vector<16x8xf32> to vector<1x16x8xf32>
    %67 = vector.shape_cast %63 : vector<16x8xf32> to vector<1x16x8xf32>
    %68 = vector.shape_cast %64 : vector<16x8xf32> to vector<1x16x8xf32>
    %69 = vector.shape_cast %65 : vector<16x8xf32> to vector<1x16x8xf32>
    %70 = tpu.concatenate %66, %67, %68, %69 in 0 : vector<1x16x8xf32>, vector<1x16x8xf32>, vector<1x16x8xf32>, vector<1x16x8xf32> -> vector<4x16x8xf32>
    %71 = vector.shape_cast %70 : vector<4x16x8xf32> to vector<4x2x8x8xf32>
    %72 = vector.shape_cast %71 : vector<4x2x8x8xf32> to vector<8x8x8xf32>
    %73 = arith.truncf %72 : vector<8x8x8xf32> to vector<8x8x8xbf16>
    %74 = vector.extract_strided_slice %49 {offsets = [0, 0], sizes = [16, 8], strides = [1, 1]} : vector<16x32xf32> to vector<16x8xf32>
    %75 = vector.extract_strided_slice %49 {offsets = [0, 8], sizes = [16, 8], strides = [1, 1]} : vector<16x32xf32> to vector<16x8xf32>
    %76 = vector.extract_strided_slice %49 {offsets = [0, 16], sizes = [16, 8], strides = [1, 1]} : vector<16x32xf32> to vector<16x8xf32>
    %77 = vector.extract_strided_slice %49 {offsets = [0, 24], sizes = [16, 8], strides = [1, 1]} : vector<16x32xf32> to vector<16x8xf32>
    %78 = vector.shape_cast %74 : vector<16x8xf32> to vector<1x16x8xf32>
    %79 = vector.shape_cast %75 : vector<16x8xf32> to vector<1x16x8xf32>
    %80 = vector.shape_cast %76 : vector<16x8xf32> to vector<1x16x8xf32>
    %81 = vector.shape_cast %77 : vector<16x8xf32> to vector<1x16x8xf32>
    %82 = tpu.concatenate %78, %79, %80, %81 in 0 : vector<1x16x8xf32>, vector<1x16x8xf32>, vector<1x16x8xf32>, vector<1x16x8xf32> -> vector<4x16x8xf32>
    %83 = vector.shape_cast %82 : vector<4x16x8xf32> to vector<4x2x8x8xf32>
    %84 = vector.shape_cast %83 : vector<4x2x8x8xf32> to vector<8x8x8xf32>
    %85 = arith.truncf %84 : vector<8x8x8xf32> to vector<8x8x8xbf16>
    %86 = tpu.iota {dimensions = array<i32: 0>} : vector<8x8xi32>
    %87 = tpu.iota {dimensions = array<i32: 1>} : vector<8x8xi32>
    %88 = arith.cmpi sle, %87, %86 : vector<8x8xi32>
    %cst_26 = arith.constant 0.000000e+00 : f32
    %cst_27 = arith.constant -1.000000e+30 : f32
    %89 = vector.broadcast %cst_26 : f32 to vector<8x8xf32>
    %90 = vector.broadcast %cst_27 : f32 to vector<8x8xf32>
    %91 = arith.select %88, %89, %90 : vector<8x8xi1>, vector<8x8xf32>
    "tpu.trace_start"() <{level = 10 : i32, message = "gtd,gsd->gts"}> : () -> ()
    %cst_28 = arith.constant dense<0.000000e+00> : vector<8x8x8xf32>
    %92 = tpu.matmul %61, %73, %cst_28 {dimension_numbers = #tpu.dot_dimension_numbers<[2], [2], [1], [1], [0, 0, 0, 1, 1, 1], [0], [0]>} : vector<8x8x8xbf16>, vector<8x8x8xbf16>, vector<8x8x8xf32> -> vector<8x8x8xf32>
    "tpu.trace_stop"() : () -> ()
    %93 = vector.shape_cast %91 : vector<8x8xf32> to vector<1x8x8xf32>
    %94 = vector.broadcast %93 : vector<1x8x8xf32> to vector<8x8x8xf32>
    %95 = arith.addf %92, %94 : vector<8x8x8xf32>
    %cst_29 = arith.constant dense<0xFF800000> : vector<8x8xf32>
    %96 = vector.multi_reduction <maximumf>, %95, %cst_29 [2] : vector<8x8x8xf32> to vector<8x8xf32>
    %97 = vector.shape_cast %96 : vector<8x8xf32> to vector<8x8x1xf32>
    %98 = vector.broadcast %97 : vector<8x8x1xf32> to vector<8x8x8xf32>
    %99 = arith.subf %95, %98 : vector<8x8x8xf32>
    %100 = math.exp %99 : vector<8x8x8xf32>
    %cst_30 = arith.constant dense<0.000000e+00> : vector<8x8xf32>
    %101 = vector.multi_reduction <add>, %100, %cst_30 [2] : vector<8x8x8xf32> to vector<8x8xf32>
    %102 = vector.shape_cast %101 : vector<8x8xf32> to vector<8x8x1xf32>
    %103 = tpu.reciprocal %102 {approx = true} : vector<8x8x1xf32> -> vector<8x8x1xf32>
    %104 = arith.mulf %102, %103 : vector<8x8x1xf32>
    %cst_31 = arith.constant 2.000000e+00 : f32
    %105 = vector.broadcast %cst_31 : f32 to vector<8x8x1xf32>
    %106 = arith.subf %105, %104 : vector<8x8x1xf32>
    %107 = arith.mulf %103, %106 : vector<8x8x1xf32>
    %108 = vector.broadcast %107 : vector<8x8x1xf32> to vector<8x8x8xf32>
    %109 = arith.mulf %100, %108 : vector<8x8x8xf32>
    %110 = arith.truncf %109 : vector<8x8x8xf32> to vector<8x8x8xbf16>
    "tpu.trace_start"() <{level = 10 : i32, message = "gts,gsd->gtd"}> : () -> ()
    %cst_32 = arith.constant dense<0.000000e+00> : vector<8x8x8xf32>
    %111 = tpu.matmul %110, %85, %cst_32 {dimension_numbers = #tpu.dot_dimension_numbers<[2], [1], [1], [2], [0, 0, 0, 1, 1, 2], [0], [0]>} : vector<8x8x8xbf16>, vector<8x8x8xbf16>, vector<8x8x8xf32> -> vector<8x8x8xf32>
    "tpu.trace_stop"() : () -> ()
    %112 = vector.shape_cast %111 : vector<8x8x8xf32> to vector<4x2x8x8xf32>
    %113 = vector.shape_cast %112 : vector<4x2x8x8xf32> to vector<4x16x8xf32>
    %114 = vector.extract_strided_slice %113 {offsets = [0, 0, 0], sizes = [1, 16, 8], strides = [1, 1, 1]} : vector<4x16x8xf32> to vector<1x16x8xf32>
    %115 = vector.shape_cast %114 : vector<1x16x8xf32> to vector<16x8xf32>
    %116 = vector.extract_strided_slice %113 {offsets = [1, 0, 0], sizes = [1, 16, 8], strides = [1, 1, 1]} : vector<4x16x8xf32> to vector<1x16x8xf32>
    %117 = vector.shape_cast %116 : vector<1x16x8xf32> to vector<16x8xf32>
    %118 = vector.extract_strided_slice %113 {offsets = [2, 0, 0], sizes = [1, 16, 8], strides = [1, 1, 1]} : vector<4x16x8xf32> to vector<1x16x8xf32>
    %119 = vector.shape_cast %118 : vector<1x16x8xf32> to vector<16x8xf32>
    %120 = vector.extract_strided_slice %113 {offsets = [3, 0, 0], sizes = [1, 16, 8], strides = [1, 1, 1]} : vector<4x16x8xf32> to vector<1x16x8xf32>
    %121 = vector.shape_cast %120 : vector<1x16x8xf32> to vector<16x8xf32>
    %122 = tpu.concatenate %115, %117, %119, %121 in 1 : vector<16x8xf32>, vector<16x8xf32>, vector<16x8xf32>, vector<16x8xf32> -> vector<16x32xf32>
    %c0_33 = arith.constant 0 : index
    %c0_34 = arith.constant 0 : index
    %c0_35 = arith.constant 0 : index
    %123 = vector.load %arg4[%c0_33, %c0_34, %c0_35] : memref<1x1x64xf32, #tpu.memory_space<vmem>>, vector<1x1x64xf32>
    %124 = vector.shape_cast %123 : vector<1x1x64xf32> to vector<1x64xf32>
    %125 = arith.truncf %122 : vector<16x32xf32> to vector<16x32xbf16>
    %c0_36 = arith.constant 0 : index
    %c0_37 = arith.constant 0 : index
    %c0_38 = arith.constant 0 : index
    %126 = vector.load %arg7[%c0_36, %c0_37, %c0_38] : memref<1x32x64xbf16, #tpu.memory_space<vmem>>, vector<1x32x64xbf16>
    %127 = vector.shape_cast %126 : vector<1x32x64xbf16> to vector<32x64xbf16>
    %cst_39 = arith.constant dense<0.000000e+00> : vector<16x64xf32>
    %128 = tpu.matmul %125, %127, %cst_39 {dimension_numbers = #tpu.dot_dimension_numbers<[1], [0], [0], [1], [0, 0, 1, 1], [], []>} : vector<16x32xbf16>, vector<32x64xbf16>, vector<16x64xf32> -> vector<16x64xf32>
    %129 = vector.broadcast %124 : vector<1x64xf32> to vector<16x64xf32>
    %130 = arith.addf %128, %129 : vector<16x64xf32>
    %cst_40 = arith.constant 5.000000e-01 : f32
    %131 = vector.broadcast %cst_40 : f32 to vector<16x64xf32>
    %132 = arith.mulf %131, %130 : vector<16x64xf32>
    %cst_41 = arith.constant 0.707106769 : f32
    %133 = vector.broadcast %cst_41 : f32 to vector<16x64xf32>
    %134 = arith.mulf %130, %133 : vector<16x64xf32>
    %cst_42 = arith.constant 0.000000e+00 : f32
    %135 = vector.broadcast %cst_42 : f32 to vector<16x64xf32>
    %136 = arith.cmpf oge, %134, %135 : vector<16x64xf32>
    %cst_43 = arith.constant 1.000000e+00 : f32
    %cst_44 = arith.constant -1.000000e+00 : f32
    %137 = vector.broadcast %cst_43 : f32 to vector<16x64xf32>
    %138 = vector.broadcast %cst_44 : f32 to vector<16x64xf32>
    %139 = arith.select %136, %137, %138 : vector<16x64xi1>, vector<16x64xf32>
    %140 = math.absf %134 : vector<16x64xf32>
    %cst_45 = arith.constant 0.327591091 : f32
    %141 = vector.broadcast %cst_45 : f32 to vector<16x64xf32>
    %142 = arith.mulf %141, %140 : vector<16x64xf32>
    %cst_46 = arith.constant 1.000000e+00 : f32
    %143 = vector.broadcast %cst_46 : f32 to vector<16x64xf32>
    %144 = arith.addf %143, %142 : vector<16x64xf32>
    %145 = tpu.reciprocal %144 {approx = true} : vector<16x64xf32> -> vector<16x64xf32>
    %cst_47 = arith.constant 1.06140542 : f32
    %146 = vector.broadcast %cst_47 : f32 to vector<16x64xf32>
    %147 = arith.mulf %146, %145 : vector<16x64xf32>
    %cst_48 = arith.constant -1.45315206 : f32
    %148 = vector.broadcast %cst_48 : f32 to vector<16x64xf32>
    %149 = arith.addf %147, %148 : vector<16x64xf32>
    %150 = arith.mulf %149, %145 : vector<16x64xf32>
    %cst_49 = arith.constant 1.42141378 : f32
    %151 = vector.broadcast %cst_49 : f32 to vector<16x64xf32>
    %152 = arith.addf %150, %151 : vector<16x64xf32>
    %153 = arith.mulf %152, %145 : vector<16x64xf32>
    %cst_50 = arith.constant -0.284496725 : f32
    %154 = vector.broadcast %cst_50 : f32 to vector<16x64xf32>
    %155 = arith.addf %153, %154 : vector<16x64xf32>
    %156 = arith.mulf %155, %145 : vector<16x64xf32>
    %cst_51 = arith.constant 0.254829586 : f32
    %157 = vector.broadcast %cst_51 : f32 to vector<16x64xf32>
    %158 = arith.addf %156, %157 : vector<16x64xf32>
    %159 = arith.mulf %158, %145 : vector<16x64xf32>
    %cst_52 = arith.constant 0.000000e+00 : f32
    %160 = vector.broadcast %cst_52 : f32 to vector<16x64xf32>
    %161 = arith.subf %160, %140 : vector<16x64xf32>
    %162 = arith.mulf %161, %140 : vector<16x64xf32>
    %163 = math.exp %162 : vector<16x64xf32>
    %164 = arith.mulf %159, %163 : vector<16x64xf32>
    %cst_53 = arith.constant 1.000000e+00 : f32
    %165 = vector.broadcast %cst_53 : f32 to vector<16x64xf32>
    %166 = arith.subf %165, %164 : vector<16x64xf32>
    %167 = arith.mulf %139, %166 : vector<16x64xf32>
    %cst_54 = arith.constant 1.000000e+00 : f32
    %168 = vector.broadcast %cst_54 : f32 to vector<16x64xf32>
    %169 = arith.addf %168, %167 : vector<16x64xf32>
    %170 = arith.mulf %132, %169 : vector<16x64xf32>
    %171 = arith.truncf %170 : vector<16x64xf32> to vector<16x64xbf16>
    %c0_55 = arith.constant 0 : index
    %c0_56 = arith.constant 0 : index
    %c0_57 = arith.constant 0 : index
    %172 = vector.load %arg8[%c0_55, %c0_56, %c0_57] : memref<1x64x32xbf16, #tpu.memory_space<vmem>>, vector<1x64x32xbf16>
    %173 = vector.shape_cast %172 : vector<1x64x32xbf16> to vector<64x32xbf16>
    %cst_58 = arith.constant dense<0.000000e+00> : vector<16x32xf32>
    %174 = tpu.matmul %171, %173, %cst_58 {dimension_numbers = #tpu.dot_dimension_numbers<[1], [0], [0], [1], [0, 0, 1, 1], [], []>} : vector<16x64xbf16>, vector<64x32xbf16>, vector<16x32xf32> -> vector<16x32xf32>
    %175 = vector.shape_cast %14 : vector<32xf32> to vector<1x32xf32>
    %176 = vector.broadcast %175 : vector<1x32xf32> to vector<16x32xf32>
    %177 = arith.addf %174, %176 : vector<16x32xf32>
    %178 = arith.addf %4, %177 : vector<16x32xf32>
    %179 = vector.shape_cast %178 : vector<16x32xf32> to vector<2x8x32xf32>
    %c0_59 = arith.constant 0 : index
    %c0_60 = arith.constant 0 : index
    %c0_61 = arith.constant 0 : index
    %180 = vector.load %arg10[%c0_59, %c0_60, %c0_61] : memref<2x8x32xf32, #tpu.memory_space<vmem>>, vector<2x8x32xf32>
    tpu.vector_store %arg10[%c0_59, %c0_60, %c0_61], %179 {strides = array<i32>} : memref<2x8x32xf32, #tpu.memory_space<vmem>>, vector<2x8x32xf32>,
    %c1_i32 = arith.constant 1 : i32
    %181 = arith.cmpi eq, %arg1, %c1_i32 : i32
    %182 = arith.extui %181 : i1 to i32
    %c0_i32_62 = arith.constant 0 : i32
    %183 = arith.cmpi ne, %182, %c0_i32_62 : i32
    scf.if %183 {
      %c0_63 = arith.constant 0 : index
      %c0_64 = arith.constant 0 : index
      %c0_65 = arith.constant 0 : index
      %184 = vector.load %arg10[%c0_63, %c0_64, %c0_65] : memref<2x8x32xf32, #tpu.memory_space<vmem>>, vector<2x8x32xf32>
      %c0_66 = arith.constant 0 : index
      %c0_67 = arith.constant 0 : index
      %c0_68 = arith.constant 0 : index
      %185 = vector.load %arg9[%c0_66, %c0_67, %c0_68] : memref<2x8x32xf32, #tpu.memory_space<vmem>>, vector<2x8x32xf32>
      tpu.vector_store %arg9[%c0_66, %c0_67, %c0_68], %184 {strides = array<i32>} : memref<2x8x32xf32, #tpu.memory_space<vmem>>, vector<2x8x32xf32>,
    } else {
    }
    return
  }
  func.func @transform_0(%arg0: i32, %arg1: i32) -> (i32, i32, i32) {
    %c0_i32 = arith.constant 0 : i32
    %c0_i32_0 = arith.constant 0 : i32
    %c0_i32_1 = arith.constant 0 : i32
    return %arg0, %c0_i32, %c0_i32_0 : i32, i32, i32
  }
  func.func @transform_1(%arg0: i32, %arg1: i32) -> (i32, i32, i32) {
    %c0_i32 = arith.constant 0 : i32
    %c0_i32_0 = arith.constant 0 : i32
    %c0_i32_1 = arith.constant 0 : i32
    return %arg1, %c0_i32, %c0_i32_0 : i32, i32, i32
  }
  func.func @transform_2(%arg0: i32, %arg1: i32) -> (i32, i32, i32) {
    %c0_i32 = arith.constant 0 : i32
    %c0_i32_0 = arith.constant 0 : i32
    %c0_i32_1 = arith.constant 0 : i32
    return %arg1, %c0_i32, %c0_i32_0 : i32, i32, i32
  }
  func.func @transform_3(%arg0: i32, %arg1: i32) -> (i32, i32, i32) {
    %c0_i32 = arith.constant 0 : i32
    %c0_i32_0 = arith.constant 0 : i32
    %c0_i32_1 = arith.constant 0 : i32
    return %arg1, %c0_i32, %c0_i32_0 : i32, i32, i32
  }
  func.func @transform_4(%arg0: i32, %arg1: i32) -> (i32, i32, i32) {
    %c0_i32 = arith.constant 0 : i32
    %c0_i32_0 = arith.constant 0 : i32
    %c0_i32_1 = arith.constant 0 : i32
    return %arg1, %c0_i32, %c0_i32_0 : i32, i32, i32
  }
  func.func @transform_5(%arg0: i32, %arg1: i32) -> (i32, i32, i32) {
    %c0_i32 = arith.constant 0 : i32
    %c0_i32_0 = arith.constant 0 : i32
    %c0_i32_1 = arith.constant 0 : i32
    return %arg1, %c0_i32, %c0_i32_0 : i32, i32, i32
  }
  func.func @transform_6(%arg0: i32, %arg1: i32) -> (i32, i32, i32) {
    %c0_i32 = arith.constant 0 : i32
    %c0_i32_0 = arith.constant 0 : i32
    %c0_i32_1 = arith.constant 0 : i32
    return %arg1, %c0_i32, %c0_i32_0 : i32, i32, i32
  }
  func.func @transform_7(%arg0: i32, %arg1: i32) -> (i32, i32, i32) {
    %c0_i32 = arith.constant 0 : i32
    %c0_i32_0 = arith.constant 0 : i32
    %c0_i32_1 = arith.constant 0 : i32
    return %arg0, %c0_i32, %c0_i32_0 : i32, i32, i32
  }
}

</mosaic_0001>

<bundles_post_ra>
// kernel: tpu_custom_call.1
= control target key start
LH: loop header
LB: loop body
LE: loop exit
PB: predicated region body
PF: predicated region fallthrough
CT: control target
= control target key end

     0   :  { %s3567_s0 = inlined_call_operand.hbm [shape: f32[2,8,32], index: 0, kind: input, shape index: {}]   ;;  %s3568_s1 = inlined_call_operand.hbm [shape: f32[2,8,32], index: 1, kind: input, shape index: {}]   ;;  %s3569_s2 = inlined_call_operand.hbm [shape: f32[2,1,64], index: 2, kind: input, shape index: {}]   ;;  %s3570_s3 = inlined_call_operand.hbm [shape: bf16[2,32,32], index: 3, kind: input, shape index: {}]   ;;  %s3571_s4 = inlined_call_operand.hbm [shape: bf16[2,32,32], index: 4, kind: input, shape index: {}]   ;;  %s3572_s5 = inlined_call_operand.hbm [shape: bf16[2,32,64], index: 5, kind: input, shape index: {}]   ;;  %s3573_s6 = inlined_call_operand.hbm [shape: bf16[2,64,32], index: 6, kind: input, shape index: {}]   ;;  %s3574_s7 = inlined_call_operand.hbm [shape: f32[2,8,32], index: 7, kind: output, shape index: {}]  }
   0x1   :  { %3592 = sst [smem:[#allocation25_spill]] %s3568_s1 }
   0x2   :  { %3593 = sst [smem:[#allocation26_spill]] %s3570_s3 }
   0x3   :  { %3594 = sst [smem:[#allocation27_spill]] %s3572_s5 }
   0x4   :  { %12 = vsyncpa [#allocation4], 0 }
   0x5   :  { %13 = vsyncpa [#allocation7], 0 }
   0x6   :  { %15 = vsyncpa [#allocation7 + $0x1], 0 }
   0x7   :  { %16 = vsyncpa [#allocation10], 0 }
   0x8   :  { %18 = vsyncpa [#allocation10 + $0x1], 0 }
   0x9   :  { %19 = vsyncpa [#allocation13], 0 }
   0xa   :  { %21 = vsyncpa [#allocation13 + $0x1], 0 }
   0xb   :  { %22 = vsyncpa [#allocation5], 0  ;;  %s2956_s24 = smov 0   ;;  %s2958_s25 = smov 0  }
   0xc   :  { %s2960_s26 = smov 0   ;;  %s2962_s27 = smov 0  }
   0xd   :  { %s2964_s28 = smov 0   ;;  %s2966_s29 = smov 0  }
   0xe LB: > { %3595 = sst [smem:[#allocation21_spill]] %s2879_s26  ;;  %s37_s30 = sadd.s32 1, %s2887_s28  ;;  %s2891_s29 = sphi %s2966_s29, %s28_s29   ;;  %s2887_s28 = sphi %s2964_s28, %s3626_s28   ;;  %s2883_s27 = sphi %s2962_s27, %s3625_s27   ;;  %s2879_s26 = sphi %s2960_s26, %s3621_s26   ;;  %s2875_s25 = sphi %s2958_s25, %s3624_s25   ;;  %s2871_s24 = sphi %s2956_s24, %s3623_s24  }
   0xf   : > { %3596 = sst [smem:[#allocation22_spill]] %s2891_s29  ;;  %s73_s8 = sadd.s32 1, %s2879_s26 }
  0x10   : > { %p38_p0 = scmp.ge.s32.totalorder %s37_s30, 2  ;;  %p80_p1 = scmp.ne.s32.totalorder %s2879_s26, %s2875_s25 }
  0x11   : > { %p81_p2 = scmp.eq.s32.totalorder %s2891_s29, 0  ;;  %p2398_p4 = scmp.lt.s32.totalorder %s2891_s29, 2 }
  0x12   : > { %s3628_s30 = smov (%p38_p0, %s37_s30), 0  ;;  %s2997_s10 = sand.u32 1, %s2891_s29  }
  0x13   : > { %3597 = sst [smem:[#allocation23_spill]] %s3628_s30  ;;  %p82_p3 = por %p81_p2, %p80_p1 }
  0x14   : > { %s70_s9 = ssub.s32 %s2887_s28, %s3628_s30  ;;  %s3000_s11 = sand.u32 1, %s2879_s26  }
  0x15   : > { %p71_p5 = scmp.eq.s32.totalorder %s70_s9, 0  ;;  %s2109_s12 = sshll.u32 %s2887_s28, 7 }
  0x16   : > { %s2108_s14 = sshll.u32 %s3000_s11, 3  ;;  %s3599_s1 = sld [smem:[#allocation25_spill]] }
  0x17   : > { %s3004_s13 = scalar_select %p71_p5, %s2879_s26, %s73_s8  }
  0x18   : > { %p3012_p6 = pnand %p2398_p4, %p82_p3  ;;  %s286_s19 = scalar_lea.vmem [#allocation6], %s2108_s14 }
  0x19   : > { %3598 = sst [smem:[#allocation24_spill]] %s3004_s13  ;;  %s293_s20 = sshll.u32 %s286_s19, 4  ;;  %s3016_s20 = int_to_ptr.vmem [resolvable:$true] %s293_s20 }
  0x1a   : > { %s3600_s18 = scalar_select %p3012_p6, 1, 0 }
  0x1b   : > { %s3575_s21 = scalar_lea.sflag [#allocation7], %s2997_s10  ;;  %p3023_p8 = pneg %p3012_p6 }
  0x1c   : > { %s3010_s17 = scalar_lea.hbm %s3599_s1, %s2109_s12  ;;  %s2596_s12 = scalar_lea.hbm %s3599_s1, 256 }
  0x1d   : > { %s2591_s22 = scalar_lea.hbm %s3010_s17, 128  ;;  %p2597_p11 = scmp.lt.u32.totalorder %s3010_s17, %s3599_s1 }
  0x1e   : > { %p2592_p7 = scmp.ne.s32.totalorder %s3010_s17, %s2591_s22  ;;  %p2598_p12 = scmp.lt.u32.totalorder %s2596_s12, %s2591_s22 }
  0x1f   : > { %s3601_s23 = scalar_select %p3023_p8, 1, 0 }
  0x20   : > { %p2594_p9 = pnand %p3023_p8, %p2592_p7  ;;  %p2599_p13 = por %p2598_p12, %p2597_p11 }
  0x21   : > { %p2600_p0 = scmp.lt.u32.totalorder %s2591_s22, %s3010_s17 }
  0x22   : > { %p2595_p10 = pneg %p2594_p9 }
  0x23   : > { %p2601_p1 = por %p2600_p0, %p2599_p13 }
  0x25   : > { %p2602_p2 = pnand %p2601_p1, %p2595_p10 }
  0x27   : > { %2605 = shalt.err (!%p2602_p2)
}
  0x28   : > { %s2606_s16 = scalar_lea.vmem %s3016_s20, 128  ;;  %s2893_s19 = smov [#allocation6]  }
  0x29   : > { %p2607_p3 = scmp.ne.s32.totalorder %s3016_s20, %s2606_s16  ;;  %s2611_s8 = sshll.u32 %s2893_s19, 4  ;;  %s2612_s8 = int_to_ptr.vmem [resolvable:$false] %s2611_s8 }
  0x2a   : > { %s2613_s9 = scalar_lea.vmem %s2612_s8, 256  ;;  %p2614_p7 = scmp.lt.s32.totalorder %s3016_s20, %s2612_s8 }
  0x2b   : > { %p2609_p4 = pnand %p2607_p3, %p3023_p8  ;;  %p2615_p9 = scmp.lt.s32.totalorder %s2613_s9, %s2606_s16 }
  0x2d   : > { %p2610_p5 = pneg %p2609_p4  ;;  %p2616_p11 = por %p2615_p9, %p2614_p7 }
  0x2f   : > { %p2617_p12 = pnand %p2616_p11, %p2610_p5 }
  0x31   : > { %2620 = shalt.err (!%p2617_p12)
}
  0x32   : > { %2381 = dma.hbm_to_vmem [thread:$0]  (!%p3012_p6), %s3010_s17, 128, %s3016_s20, %s3575_s21  }
  0x33   : > { %s3050_s12 = sshll.u32 %s3000_s11, 4  ;;  %s3053_s14 = sshll.u32 %s2887_s28, 8 }
  0x34   : > { %s3602_s3 = sld [smem:[#allocation26_spill]]  ;;  %s321_s8 = scalar_lea.vmem [#allocation9], %s3050_s12 }
  0x35   : > { %s328_s9 = sshll.u32 %s321_s8, 4  ;;  %s3577_s17 = scalar_lea.sflag [#allocation10], %s2997_s10  ;;  %s3062_s9 = int_to_ptr.vmem [resolvable:$true] %s328_s9 }
  0x3a   : > { %s3059_s19 = scalar_lea.hbm %s3602_s3, %s3053_s14  ;;  %s2626_s15 = scalar_lea.hbm %s3602_s3, 512 }
  0x3b   : > { %s2621_s20 = scalar_lea.hbm %s3059_s19, 256  ;;  %p2627_p1 = scmp.lt.u32.totalorder %s3059_s19, %s3602_s3 }
  0x3c   : > { %p2622_p10 = scmp.ne.s32.totalorder %s3059_s19, %s2621_s20  ;;  %p2628_p2 = scmp.lt.u32.totalorder %s2626_s15, %s2621_s20 }
  0x3d   : > { %p2630_p4 = scmp.lt.u32.totalorder %s2621_s20, %s3059_s19 }
  0x3e   : > { %p2624_p13 = pnand %p2622_p10, %p3023_p8  ;;  %p2629_p3 = por %p2628_p2, %p2627_p1 }
  0x40   : > { %p2625_p0 = pneg %p2624_p13  ;;  %p2631_p5 = por %p2630_p4, %p2629_p3 }
  0x42   : > { %p2632_p7 = pnand %p2631_p5, %p2625_p0 }
  0x44   : > { %2635 = shalt.err (!%p2632_p7)
}
  0x45   : > { %s2636_s8 = scalar_lea.vmem %s3062_s9, 256  ;;  %s2894_s21 = smov [#allocation9]  }
  0x46   : > { %p2637_p9 = scmp.ne.s32.totalorder %s3062_s9, %s2636_s8  ;;  %s2641_s22 = sshll.u32 %s2894_s21, 4  ;;  %s2642_s22 = int_to_ptr.vmem [resolvable:$false] %s2641_s22 }
  0x47   : > { %s2643_s1 = scalar_lea.vmem %s2642_s22, 512  ;;  %p2644_p10 = scmp.lt.s32.totalorder %s3062_s9, %s2642_s22 }
  0x48   : > { %p2639_p11 = pnand %p2637_p9, %p3023_p8  ;;  %p2645_p13 = scmp.lt.s32.totalorder %s2643_s1, %s2636_s8 }
  0x4a   : > { %p2640_p12 = pneg %p2639_p11  ;;  %p2646_p1 = por %p2645_p13, %p2644_p10 }
  0x4c   : > { %p2647_p2 = pnand %p2646_p1, %p2640_p12 }
  0x4e   : > { %2650 = shalt.err (!%p2647_p2)
}
  0x4f   : > { %s3579_s20 = smov 64   ;;  %s3581_s15 = smov 4  }
  0x50   : > { %2387 = dma.hbm_to_vmem [thread:$0]  (!%p3012_p6), %s3059_s19, 256, %s3062_s9, %s3577_s17, %s3579_s20, %s3579_s20, %s3581_s15  }
  0x51   : > { %s3603_s5 = sld [smem:[#allocation27_spill]]  ;;  %s363_s22 = scalar_lea.vmem [#allocation12], %s3050_s12 }
  0x52   : > { %s370_s1 = sshll.u32 %s363_s22, 4  ;;  %s3578_s3 = scalar_lea.sflag [#allocation13], %s2997_s10  ;;  %s3098_s1 = int_to_ptr.vmem [resolvable:$true] %s370_s1 }
  0x57   : > { %s3095_s21 = scalar_lea.hbm %s3603_s5, %s3053_s14  ;;  %s2656_s16 = scalar_lea.hbm %s3603_s5, 512 }
  0x58   : > { %s2651_s30 = scalar_lea.hbm %s3095_s21, 256  ;;  %p2657_p5 = scmp.lt.u32.totalorder %s3095_s21, %s3603_s5 }
  0x59   : > { %p2652_p0 = scmp.ne.s32.totalorder %s3095_s21, %s2651_s30  ;;  %p2658_p7 = scmp.lt.u32.totalorder %s2656_s16, %s2651_s30 }
  0x5a   : > { %p2660_p11 = scmp.lt.u32.totalorder %s2651_s30, %s3095_s21 }
  0x5b   : > { %p2654_p3 = pnand %p2652_p0, %p3023_p8  ;;  %p2659_p9 = por %p2658_p7, %p2657_p5 }
  0x5d   : > { %p2655_p4 = pneg %p2654_p3  ;;  %p2661_p12 = por %p2660_p11, %p2659_p9 }
  0x5f   : > { %p2662_p10 = pnand %p2661_p12, %p2655_p4 }
  0x61   : > { %2665 = shalt.err (!%p2662_p10)
}
  0x62   : > { %s2666_s22 = scalar_lea.vmem %s3098_s1, 256  ;;  %s2897_s19 = smov [#allocation12]  }
  0x63   : > { %p2667_p13 = scmp.ne.s32.totalorder %s3098_s1, %s2666_s22  ;;  %s2671_s9 = sshll.u32 %s2897_s19, 4  ;;  %s2672_s9 = int_to_ptr.vmem [resolvable:$false] %s2671_s9 }
  0x64   : > { %s2673_s17 = scalar_lea.vmem %s2672_s9, 512  ;;  %p2674_p0 = scmp.lt.s32.totalorder %s3098_s1, %s2672_s9 }
  0x65   : > { %p2669_p1 = pnand %p2667_p13, %p3023_p8  ;;  %p2675_p3 = scmp.lt.s32.totalorder %s2673_s17, %s2666_s22 }
  0x67   : > { %p2670_p2 = pneg %p2669_p1  ;;  %p2676_p5 = por %p2675_p3, %p2674_p0 }
  0x69   : > { %p2677_p7 = pnand %p2676_p5, %p2670_p2 }
  0x6b   : > { %2680 = shalt.err (!%p2677_p7)
}
  0x6c   : > { %2393 = dma.hbm_to_vmem [thread:$0]  (!%p3012_p6), %s3095_s21, 256, %s3098_s1, %s3578_s3, %s3579_s20, %s3579_s20, %s3581_s15  }
  0x6d   : > { %s3128_s30 = sadd.s32 4294967295, %s2891_s29   ;;  %p86_p4 = scmp.ne.s32.totalorder %s2875_s25, %s2871_s24 }
  0x6e   : > { %p3584_p9 = scmp.eq.s32.totalorder %s3128_s30, 0  ;;  %p2105_p11 = scmp.ge.s32.totalorder %s2891_s29, 1 }
  0x6f   : > { %p253_p12 = scmp.lt.s32.totalorder %s2891_s29, 3  ;;  %s2898_s21 = smov [#allocation3]  }
  0x70   : > { %p3137_p10 = por %p3584_p9, %p86_p4  ;;  %s268_s1 = sshll.u32 %s2898_s21, 4  ;;  %s3145_s1 = int_to_ptr.vmem [resolvable:$true] %s268_s1 }
  0x71   : > { %p3141_p13 = pnand %p2105_p11, %p253_p12  ;;  %s2110_s24 = sshll.u32 %s2887_s28, 4 }
  0x72   : > { %s3604_s16 = scalar_select %p3137_p10, 1, 0 }
  0x73   : > { %s3605_s8 = scalar_select %p3141_p13, 1, 0 }
  0x74   : > { %p2374_p1 = pneg %p3141_p13  ;;  %s3159_s17 = scalar_lea.hbm %s3569_s2, %s2110_s24 }
  0x75   : > { %s303_s3 = scalar_lea.vmem [#allocation8], %s3000_s11  ;;  %s2681_s5 = scalar_lea.hbm %s3567_s0, 256 }
  0x76   : > { %p3152_p2 = pnand %p2374_p1, %p3584_p9  ;;  %s310_s20 = sshll.u32 %s303_s3, 4  ;;  %s3162_s20 = int_to_ptr.vmem [resolvable:$true] %s310_s20 }
  0x77   : > { %p2682_p0 = scmp.ne.s32.totalorder %s3567_s0, %s2681_s5  ;;  %p2688_p4 = scmp.lt.u32.totalorder %s2681_s5, %s3567_s0 }
  0x78   : > { %p2683_p3 = pneg %p3152_p2 }
  0x7a   : > { %p2684_p5 = pnand %p2683_p3, %p2682_p0 }
  0x7c   : > { %p2685_p7 = pneg %p2684_p5 }
  0x7e   : > { %p2690_p11 = pnand %p2688_p4, %p2685_p7 }
  0x80   : > { %2693 = shalt.err (!%p2690_p11)
}
  0x81   : > { %s2694_s3 = scalar_lea.vmem %s3145_s1, 256  ;;  %p2702_p10 = scmp.lt.s32.totalorder %s3145_s1, %s3145_s1 }
  0x82   : > { %p2695_p12 = scmp.ne.s32.totalorder %s3145_s1, %s2694_s3  ;;  %p2703_p13 = scmp.lt.s32.totalorder %s2694_s3, %s2694_s3 }
  0x84   : > { %p2697_p1 = pnand %p2695_p12, %p2683_p3  ;;  %p2704_p6 = por %p2703_p13, %p2702_p10 }
  0x86   : > { %p2698_p9 = pneg %p2697_p1 }
  0x88   : > { %p2705_p8 = pnand %p2704_p6, %p2698_p9 }
  0x8a   : > { %2708 = shalt.err (!%p2705_p8)
}
  0x8b   : > { %s2899_s26 = smov 128   ;;  %s2900_s5 = smov 8  }
  0x8c   : > { %2377 = dma.hbm_to_vmem [thread:$0]  (!%p3152_p2), %s3567_s0, 256, %s3145_s1, [#allocation4], %s2899_s26, %s2899_s26, %s2900_s5  }
  0x8d   : > { %s2709_s24 = scalar_lea.hbm %s3159_s17, 16  ;;  %p3607_p3 = scmp.ne.s32.totalorder %s3601_s23, 0 }
  0x8e   : > { %p2710_p0 = scmp.ne.s32.totalorder %s3159_s17, %s2709_s24  ;;  %s2714_s9 = scalar_lea.hbm %s3569_s2, 32 }
  0x8f   : > { %p2715_p8 = scmp.lt.u32.totalorder %s3159_s17, %s3569_s2  ;;  %p2716_p9 = scmp.lt.u32.totalorder %s2714_s9, %s2709_s24 }
  0x90   : > { %p2712_p10 = pnand %p2710_p0, %p3607_p3  ;;  %p2718_p5 = scmp.lt.u32.totalorder %s2709_s24, %s3159_s17 }
  0x91   : > { %p2717_p13 = por %p2716_p9, %p2715_p8 }
  0x92   : > { %p2713_p6 = pneg %p2712_p10 }
  0x93   : > { %p2719_p7 = por %p2718_p5, %p2717_p13 }
  0x95   : > { %p2720_p4 = pnand %p2719_p7, %p2713_p6 }
  0x97   : > { %2723 = shalt.err (!%p2720_p4)
}
  0x98   : > { %s2724_s1 = scalar_lea.vmem %s3162_s20, 16  ;;  %s2901_s22 = smov [#allocation8]  }
  0x99   : > { %p2725_p2 = scmp.ne.s32.totalorder %s3162_s20, %s2724_s1  ;;  %s2729_s26 = sshll.u32 %s2901_s22, 4  ;;  %s2730_s26 = int_to_ptr.vmem [resolvable:$false] %s2729_s26 }
  0x9a   : > { %s2731_s29 = scalar_lea.vmem %s2730_s26, 32  ;;  %p2732_p1 = scmp.lt.s32.totalorder %s3162_s20, %s2730_s26 }
  0x9b   : > { %p2727_p11 = pnand %p2725_p2, %p3607_p3  ;;  %p2733_p0 = scmp.lt.s32.totalorder %s2731_s29, %s2724_s1 }
  0x9d   : > { %p2728_p12 = pneg %p2727_p11  ;;  %p2734_p10 = por %p2733_p0, %p2732_p1 }
  0x9f   : > { %p2735_p8 = pnand %p2734_p10, %p2728_p12 }
  0xa1   : > { %2738 = shalt.err (!%p2735_p8)
}
  0xa2   : > { %p3608_p6 = scmp.ne.s32.totalorder %s3600_s18, 0  ;;  %s3609_s5 = scalar_lea.sflag [#allocation7], %s2997_s10 }
  0xa3   : > { %s3212_s24 = scalar_lea.hbm %s3571_s4, %s3053_s14  ;;  %s342_s21 = scalar_lea.vmem [#allocation11], %s3050_s12 }
  0xa4   : > { %2384 = dma.hbm_to_vmem [thread:$0]  (!%p3608_p6), %s3159_s17, 16, %s3162_s20, %s3609_s5  }
  0xa5   : > { %s349_s19 = sshll.u32 %s342_s21, 4  ;;  %s2739_s9 = scalar_lea.hbm %s3212_s24, 256  ;;  %s3215_s19 = int_to_ptr.vmem [resolvable:$true] %s349_s19 }
  0xa6   : > { %p2740_p9 = scmp.ne.s32.totalorder %s3212_s24, %s2739_s9  ;;  %s2744_s17 = scalar_lea.hbm %s3571_s4, 512 }
  0xa7   : > { %p2745_p7 = scmp.lt.u32.totalorder %s3212_s24, %s3571_s4  ;;  %p2746_p4 = scmp.lt.u32.totalorder %s2744_s17, %s2739_s9 }
  0xa8   : > { %p2742_p13 = pnand %p2740_p9, %p3607_p3  ;;  %p2748_p11 = scmp.lt.u32.totalorder %s2739_s9, %s3212_s24 }
  0xa9   : > { %p2747_p2 = por %p2746_p4, %p2745_p7 }
  0xaa   : > { %p2743_p5 = pneg %p2742_p13 }
  0xab   : > { %p2749_p12 = por %p2748_p11, %p2747_p2 }
  0xad   : > { %p2750_p1 = pnand %p2749_p12, %p2743_p5 }
  0xaf   : > { %2753 = shalt.err (!%p2750_p1)
}
  0xb0   : > { %s2754_s12 = scalar_lea.vmem %s3215_s19, 256  ;;  %s2902_s22 = smov [#allocation11]  }
  0xb1   : > { %p2755_p0 = scmp.ne.s32.totalorder %s3215_s19, %s2754_s12  ;;  %s2759_s26 = sshll.u32 %s2902_s22, 4  ;;  %s2760_s26 = int_to_ptr.vmem [resolvable:$false] %s2759_s26 }
  0xb2   : > { %s2761_s29 = scalar_lea.vmem %s2760_s26, 512  ;;  %p2762_p9 = scmp.lt.s32.totalorder %s3215_s19, %s2760_s26 }
  0xb3   : > { %p2757_p10 = pnand %p2755_p0, %p3607_p3  ;;  %p2763_p13 = scmp.lt.s32.totalorder %s2761_s29, %s2754_s12 }
  0xb5   : > { %p2758_p8 = pneg %p2757_p10  ;;  %p2764_p7 = por %p2763_p13, %p2762_p9 }
  0xb7   : > { %p2765_p4 = pnand %p2764_p7, %p2758_p8 }
  0xb9   : > { %2768 = shalt.err (!%p2765_p4)
}
  0xba   : > { %s3610_s5 = smov 4   ;;  %s3611_s13 = smov 64  }
  0xbb   : > { %s3612_s15 = scalar_lea.sflag [#allocation10], %s2997_s10  ;;  %s2175_s21 = sshll.u32 %s2887_s28, 9 }
  0xbc   : > { %2390 = dma.hbm_to_vmem [thread:$0]  (!%p3608_p6), %s3212_s24, 256, %s3215_s19, %s3612_s15, %s3611_s13, %s3611_s13, %s3610_s5  }
  0xbd   : > { %s3613_s9 = sshll.u32 %s3000_s11, 5  ;;  %s3249_s14 = scalar_lea.hbm %s3573_s6, %s2175_s21 }
  0xbe   : > { %s384_s3 = scalar_lea.vmem [#allocation14], %s3613_s9  ;;  %s2769_s12 = scalar_lea.hbm %s3249_s14, 512 }
  0xbf   : > { %s391_s20 = sshll.u32 %s384_s3, 4  ;;  %p2770_p5 = scmp.ne.s32.totalorder %s3249_s14, %s2769_s12  ;;  %s3251_s20 = int_to_ptr.vmem [resolvable:$true] %s391_s20 }
  0xc0   : > { %s2774_s19 = scalar_lea.hbm %s3573_s6, 1024  ;;  %p2775_p12 = scmp.lt.u32.totalorder %s3249_s14, %s3573_s6 }
  0xc1   : > { %p2772_p2 = pnand %p2770_p5, %p3607_p3  ;;  %p2776_p1 = scmp.lt.u32.totalorder %s2774_s19, %s2769_s12 }
  0xc2   : > { %p2778_p10 = scmp.lt.u32.totalorder %s2769_s12, %s3249_s14 }
  0xc3   : > { %p2773_p11 = pneg %p2772_p2  ;;  %p2777_p0 = por %p2776_p1, %p2775_p12 }
  0xc5   : > { %p2779_p8 = por %p2778_p10, %p2777_p0 }
  0xc7   : > { %p2780_p9 = pnand %p2779_p8, %p2773_p11 }
  0xc9   : > { %2783 = shalt.err (!%p2780_p9)
}
  0xca   : > { %s2784_s29 = scalar_lea.vmem %s3251_s20, 512  ;;  %s2903_s15 = smov [#allocation14]  }
  0xcb   : > { %p2785_p13 = scmp.ne.s32.totalorder %s3251_s20, %s2784_s29  ;;  %s2789_s21 = sshll.u32 %s2903_s15, 4  ;;  %s2790_s21 = int_to_ptr.vmem [resolvable:$false] %s2789_s21 }
  0xcc   : > { %s2791_s9 = scalar_lea.vmem %s2790_s21, 1024  ;;  %p2792_p5 = scmp.lt.s32.totalorder %s3251_s20, %s2790_s21 }
  0xcd   : > { %p2787_p7 = pnand %p2785_p13, %p3607_p3  ;;  %p2793_p2 = scmp.lt.s32.totalorder %s2791_s9, %s2784_s29 }
  0xcf   : > { %p2788_p4 = pneg %p2787_p7  ;;  %p2794_p12 = por %p2793_p2, %p2792_p5 }
  0xd1   : > { %p2795_p1 = pnand %p2794_p12, %p2788_p4 }
  0xd3   : > { %2798 = shalt.err (!%p2795_p1)
}
  0xd4   : > { %s3614_s3 = scalar_lea.sflag [#allocation13], %s2997_s10  ;;  %p3615_p3 = scmp.ne.s32.totalorder %s3605_s8, 0 }
  0xd5   : > { %2396 = dma.hbm_to_vmem [thread:$0]  (!%p3608_p6), %s3249_s14, 512, %s3251_s20, %s3614_s3, %s3611_s13, %s3611_s13, %s3610_s5  }
  0xd6   : > { %403 = sbr.rel (%p3615_p3) target bundleno = 2672 (0xa70), region = 48  ;;  %p3616_p11 = scmp.eq.s32.totalorder (!%p3615_p3), %s3128_s30, 0 }
  0xdd   : > { %2850 = dma.done.wait (%p3616_p11), [#allocation4], 256   ;;  %p3617_p0 = pmov %p3616_p11 }
  0xde   : > { %s409_s18 = sand.u32 1, %s3128_s30   ;;  %s3287_s23 = sand.u32 1, %s2875_s25  }
  0xdf   : > { %2852 = vsyncadd (%p3617_p0), [#allocation4], 4294967040  ;;  %s2125_s10 = sshll.u32 %s3287_s23, 3  ;;  %s410_s17 = scalar_lea.sflag [#allocation7], %s409_s18 }
  0xe0   : > { %s3290_s1 = scalar_lea.vmem [#allocation6], %s2125_s10  ;;  %p3618_p6 = scmp.ne.s32.totalorder %s3604_s16, 0 }
  0xe2   : > { %2854 = dma.done.wait (%p3618_p6), %s410_s17, 144  }
  0xe3   : > { %2856 = vsyncadd (%p3618_p6), %s410_s17, 4294967152  ;;  %s3297_s8 = sshll.u32 %s3287_s23, 4  ;;  %s421_s5 = scalar_lea.vmem [#allocation8], %s3287_s23 }
  0xe4   : > { %s427_s13 = scalar_lea.sflag [#allocation10], %s409_s18  ;;  %s430_s20 = scalar_lea.vmem [#allocation9], %s3297_s8 }
  0xe5   : > { %2858 = dma.done.wait (%p3618_p6), %s427_s13, 512  }
  0xe6   : > { %2860 = vsyncadd (%p3618_p6), %s427_s13, 4294966784  ;;  %s439_s14 = scalar_lea.vmem [#allocation11], %s3297_s8  ;;  %s445_s12 = scalar_lea.sflag [#allocation13], %s409_s18 }
  0xe7   : > { %s448_s24 = scalar_lea.vmem [#allocation12], %s3297_s8 }
  0xe8   : > { %2862 = dma.done.wait (%p3618_p6), %s445_s12, 768  }
  0xe9   : > { %2864 = vsyncadd (%p3618_p6), %s445_s12, 4294966528  ;;  %s2129_s11 = sshll.u32 %s3287_s23, 5  ;;  %p2130_p10 = scmp.ne.s32.totalorder %s2883_s27, 0 }
  0xea   : > { %s3312_s19 = scalar_lea.vmem [#allocation14], %s2129_s11  ;;  %v514_v0 = vld [vmem:[#allocation3] sm:$0xff] (!%p2130_p10)  ;;  %vm516_vm0 = vcmask (!%p2130_p10), 261120   ;;  %v515_v1 = vld [vmem:[#allocation3 + $0x8] sm:$0xff] (!%p2130_p10) }
  0xeb   : > { %513 = sbr.rel (%p2130_p10) target bundleno = 560 (0x230), region = 80  ;;  %v517_v2 = vsel (!%p2130_p10), %vm516_vm0, %v514_v0, -inf  ;;  %v520_v3 = vsel (!%p2130_p10), %vm516_vm0, %v515_v1, -inf }
  0xec   : > { %518 = vmax.xlane.f32.xlu0 (!%p2130_p10), %v517_v2 }
  0xf0   : > { %521 = vmax.xlane.f32.xlu0 (!%p2130_p10), %v520_v3 }
 0x179   : > { %v519_v4 = vpop.xlane.xlu0 %518 }
 0x17a   : > { %v523_v5 = vsub.f32 %v514_v0, %v519_v4 }
 0x17c   : > { %v525_v6 = vmul.f32 1.442695, %v523_v5 }
 0x17d   : > { %v522_v7 = vpop.xlane.xlu0 %521 }
 0x17e   : > { %2467 = vpow2.f32 %v525_v6  ;;  %v524_v8 = vsub.f32 %v515_v1, %v522_v7 }
 0x180   : > { %v527_v9 = vmul.f32 1.442695, %v524_v8 }
 0x182   : > { %2469 = vpow2.f32 %v527_v9 }
 0x188   : > { %v2468_v10 = vpop.eup %2467 }
 0x189   : > { %v529_v11 = vsel %vm516_vm0, %v2468_v10, 0.0 }
 0x18a   : > { %530 = vadd.xlane.f32.xlu1 %v529_v11 }
 0x18c   : > { %v2470_v12 = vpop.eup %2469 }
 0x18d   : > { %v532_v13 = vsel %vm516_vm0, %v2470_v12, 0.0 }
 0x18e   : > { %533 = vadd.xlane.f32.xlu1 %v532_v13 }
 0x217   : > { %v531_v14 = vpop.xlane.xlu1 %530 }
 0x218   : > { %2471 = vrcp.f32 %v531_v14 }
 0x21b   : > { %v534_v15 = vpop.xlane.xlu1 %533 }
 0x21c   : > { %2473 = vrcp.f32 %v534_v15 }
 0x222   : > { %v2472_v16 = vpop.eup %2471 }
 0x223   : > { %v537_v17 = vmul.f32 %v2472_v16, %v531_v14 }
 0x225   : > { %v539_v18 = vsub.f32 2.0, %v537_v17 }
 0x226   : > { %v2474_v19 = vpop.eup %2473 }
 0x227   : > { %v541_v20 = vmul.f32 %v2472_v16, %v539_v18  ;;  %v538_v21 = vmul.f32 %v2474_v19, %v534_v15 }
 0x229   : > { %v543_v22 = vmul.f32 %v2468_v10, %v541_v20  ;;  %v540_v23 = vsub.f32 2.0, %v538_v21 }
 0x22b   : > { %545 = vst.msk [vmem:[#allocation2] sm:$0xff] %vm516_vm0, %v543_v22  ;;  %v542_v24 = vmul.f32 %v2474_v19, %v540_v23 }
 0x22d   : > { %v544_v25 = vmul.f32 %v2470_v12, %v542_v24 }
 0x22f   : > { %546 = vst.msk [vmem:[#allocation2 + $0x8] sm:$0xff] %vm516_vm0, %v544_v25 }
 0x230 PF: > { %vm554_vm1 = vcmask 261120   ;;  %v2535_v40 = vld [vmem:[%s430_s20] sm:$0xff]   ;;  %v2904_v41 = vmov 0.0   ;;  %v2537_v43 = vld [vmem:[%s430_s20 + $0x8] sm:$0xff]   ;;  %vm2905_vm2 = vmmov 0   ;;  %vm810_vm3 = vcmask 64512  }
 0x231   : > { %2222 = vmatprep.subr.bf16.mxu0 %v2904_v41  ;;  %2230 = vmatprep.subr.bf16.mxu1 %v2904_v41  ;;  %v2536_v42 = vld [vmem:[%s439_s14] sm:$0xff]   ;;  %v2538_v44 = vld [vmem:[%s439_s14 + $0x8] sm:$0xff]   ;;  %s2906_s16 = smov 120   ;;  %s2907_s22 = smov 104   ;;  %vm1302_vm4 = vcmask 1043456   ;;  %vm1694_vm6 = vcmask 130048  }
 0x232   : > { %v547_v26 = vld [vmem:[#allocation2] sm:$0xff]  ;;  %2223 = vmatpush3.bf16.msra.mxu0 %v2535_v40  ;;  %2231 = vmatpush3.bf16.msra.mxu1 %v2536_v42  ;;  %s2908_s26 = smov 112   ;;  %s2910_s29 = smov 8   ;;  %vm1697_vm7 = vcmask 195584   ;;  %vm1857_vm10 = vcmask 523264  }
 0x233   : > { %v555_v28 = vsel %vm554_vm1, %v547_v26, 0.0  ;;  %2224 = vmatprep.subr.bf16.mxu0 %v2904_v41  ;;  %2232 = vmatprep.subr.bf16.mxu1 %v2904_v41  ;;  %v2131_v52 = vld [vmem:[%s3290_s1] ss:$0 sm:$0xff]  ;;  %v2132_v54 = vld [vmem:[%s3290_s1 + $0x1] ss:$0 sm:$0xff]  ;;  %s2911_s15 = smov 16  }
 0x234   : > { %556 = vadd.xlane.f32.xlu0 %v555_v28  ;;  %2226 = vmatprep.mubr.msk.bf16.mxu0 %vm2905_vm2, %v2904_v41  ;;  %v2133_v5 = vld [vmem:[%s3290_s1 + $0x2] ss:$0 sm:$0xff]  ;;  %v2137_v10 = vld [vmem:[%s3290_s1 + $0x3] ss:$0 sm:$0xff]  ;;  %s2912_s21 = smov 24   ;;  %p2167_p8 = scmp.ne.s32.totalorder %s2883_s27, 1 }
 0x235   : > { %2234 = vmatprep.mubr.msk.bf16.mxu1 %vm2905_vm2, %v2904_v41 }
 0x236   : > { %v548_v27 = vld [vmem:[#allocation2 + $0x8] sm:$0xff]  ;;  %2225 = vmatpush3.bf16.msra.mxu0 %v2537_v43  ;;  %2233 = vmatpush3.bf16.msra.mxu1 %v2538_v44 }
 0x237   : > { %v558_v29 = vsel %vm554_vm1, %v548_v27, 0.0  ;;  %2238 = vmatprep.subr.bf16.mxu0 %v2904_v41  ;;  %2244 = vmatprep.subr.bf16.mxu1 %v2904_v41 }
 0x238   : > { %559 = vadd.xlane.f32.xlu0 %v558_v29 }
 0x2c1   : > { %v557_v30 = vpop.xlane.xlu0 %556 }
 0x2c2   : > { %v562_v31 = vmul.f32 0.03125, %v557_v30 }
 0x2c4   : > { %v564_v32 = vsub.f32 %v547_v26, %v562_v31 }
 0x2c5   : > { %v560_v33 = vpop.xlane.xlu0 %559 }
 0x2c6   : > { %v563_v34 = vmul.f32 0.03125, %v560_v33  ;;  %v566_v35 = vmul.f32 %v564_v32, %v564_v32 }
 0x2c8   : > { %v565_v36 = vsub.f32 %v548_v27, %v563_v34  ;;  %v568_v37 = vsel %vm554_vm1, %v566_v35, 0.0 }
 0x2c9   : > { %569 = vadd.xlane.f32.xlu1 %v568_v37 }
 0x2ca   : > { %v567_v38 = vmul.f32 %v565_v36, %v565_v36 }
 0x2cc   : > { %v571_v39 = vsel %vm554_vm1, %v567_v38, 0.0 }
 0x2cd   : > { %572 = vadd.xlane.f32.xlu1 %v571_v39 }
 0x356   : > { %v570_v45 = vpop.xlane.xlu1 %569 }
 0x357   : > { %v574_v46 = vmul.f32 0.03125, %v570_v45 }
 0x359   : > { %v576_v47 = vadd.f32 1e-05, %v574_v46 }
 0x35a   : > { %v573_v48 = vpop.xlane.xlu1 %572 }
 0x35b   : > { %2545 = vrsqrt.f32 %v576_v47  ;;  %v575_v49 = vmul.f32 0.03125, %v573_v48 }
 0x35d   : > { %v577_v50 = vadd.f32 1e-05, %v575_v49 }
 0x35f   : > { %2547 = vrsqrt.f32 %v577_v50 }
 0x365   : > { %v2546_v51 = vpop.eup %2545 }
 0x366   : > { %v580_v53 = vmul.f32 %v2546_v51, %v564_v32 }
 0x368   : > { %v586_v55 = vmul.f32 %v2131_v52, %v580_v53 }
 0x369   : > { %v2548_v56 = vpop.eup %2547 }
 0x36a   : > { %v581_v57 = vmul.f32 %v2548_v56, %v565_v36  ;;  %v592_v58 = vadd.f32 %v2132_v54, %v586_v55 }
 0x36c   : > { %v587_v59 = vmul.f32 %v2131_v52, %v581_v57  ;;  %v768_v61 = vpack.c.bf16 %v592_v58, %v592_v58 }
 0x36e   : > { %v593_v60 = vadd.f32 %v2132_v54, %v587_v59  ;;  %v815_v1 = vsel %vm810_vm3, %v768_v61, 0 }
 0x370   : > { %v2475_v62 = vpack.i.bf16 %v593_v60, %v592_v58  ;;  %v594_v63 = vpack.c.bf16 %v593_v60, %v592_v58  ;;  %v769_v0 = vpack.c.bf16 %v593_v60, %v593_v60 }
 0x372   : > { %2476 = vrot.lane.b32.xlu0 %v2475_v62, %s2906_s16  ;;  %2227 = vmatmul.mubr.msk.bf16.vlgmr.msra.gmra.mrb[0].mxu0 %vm554_vm1, %v594_v63  ;;  %v861_v2 = vsel %vm810_vm3, %v769_v0, 0 }
 0x373   : > { %2235 = vmatmul.mubr.msk.bf16.vlgmr.msra.gmra.mrb[0].mxu1 %vm554_vm1, %v594_v63  ;;  %2239 = vmatpush3.bf16.xpose.msra.mxu0 %v815_v1  ;;  %v2909_v1 = vmov -1e+30  }
 0x374   : > { %2245 = vmatpush3.bf16.xpose.msra.mxu1 %v861_v2  ;;  %2240 = vmatprep.mubr.msk.bf16.mxu0 %vm2905_vm2, %v2904_v41 }
 0x375   : > { %2250 = vmatprep.subr.bf16.mxu0 %v2904_v41  ;;  %2246 = vmatprep.mubr.msk.bf16.mxu1 %vm2905_vm2, %v2904_v41 }
 0x376   : > { %2496 = vrot.lane.b32.xlu0 %v2475_v62, %s2907_s22  ;;  %2256 = vmatprep.subr.bf16.mxu1 %v2904_v41 }
 0x3e4   : > { %v2477_v3 = vpop.permute.xlu0 %2476 }
 0x3e5   : > { %v2478_v4 = vunpack.i.l.bf16 %v2477_v3  ;;  %v2479_v6 = vunpack.i.h.bf16 %v2477_v3 }
 0x3e7   : > { %v770_v7 = vpack.c.bf16 %v2478_v4, %v2478_v4  ;;  %v771_v15 = vpack.c.bf16 %v2479_v6, %v2479_v6 }
 0x3e8   : > { %v2497_v36 = vpop.permute.xlu0 %2496 }
 0x3e9   : > { %v907_v23 = vsel %vm810_vm3, %v770_v7, 0  ;;  %v953_v27 = vsel %vm810_vm3, %v771_v15, 0  ;;  %v2499_v40 = vunpack.i.h.bf16 %v2497_v36  ;;  %v2498_v42 = vunpack.i.l.bf16 %v2497_v36 }
 0x3eb   : > { %v775_v47 = vpack.c.bf16 %v2499_v40, %v2499_v40  ;;  %v774_v48 = vpack.c.bf16 %v2498_v42, %v2498_v42 }
 0x3ed   : > { %v1091_v52 = vsel %vm810_vm3, %v774_v48, 0  ;;  %v1137_v53 = vsel %vm810_vm3, %v775_v47, 0 }
 0x445   : > { %v652_v8 = vpop.f32.mrb[0].mxu0 }
 0x446   : > { %v653_v9 = vadd.f32 %v2133_v5, %v652_v8  ;;  %v713_v11 = vpop.f32.mrb[0].mxu1  ;;  %v2228_v12 = vpop.f32.mrb[1].mxu0 }
 0x447   : > { %v2236_v13 = vpop.f32.mrb[1].mxu1  ;;  %v655_v14 = vpop.f32.mrb[2].mxu0  ;;  %v3359_v20 = vadd.f32 %v2137_v10, %v713_v11 }
 0x448   : > { %v740_v16 = vpack.c.bf16 %v653_v9, %v653_v9  ;;  %v656_v17 = vadd.f32 %v2133_v5, %v655_v14  ;;  %v716_v18 = vpop.f32.mrb[2].mxu1  ;;  %v2229_v19 = vpop.f32.mrb[3].mxu0 }
 0x449   : > { %v3361_v21 = vadd.f32 %v2137_v10, %v716_v18  ;;  %v2237_v22 = vpop.f32.mrb[3].mxu1  ;;  %v796_v56 = vpack.c.bf16 %v3359_v20, %v3359_v20 }
 0x44a   : > { %v741_v24 = vpack.c.bf16 %v656_v17, %v656_v17  ;;  %2241 = vmatmul.mubr.msk.bf16.vlgmr.msra.gmra.mrb[4].mxu0 %vm810_vm3, %v740_v16  ;;  %v2480_v25 = vpack.i.bf16 %v656_v17, %v653_v9 }
 0x44b   : > { %2251 = vmatpush3.bf16.xpose.msra.mxu0 %v907_v23  ;;  %2252 = vmatprep.mubr.msk.bf16.mxu0 %vm2905_vm2, %v2904_v41  ;;  %v3369_v26 = vpack.i.bf16 %v3361_v21, %v3359_v20  ;;  %v797_v57 = vpack.c.bf16 %v3361_v21, %v3361_v21  ;;  %v1304_v60 = vsel %vm1302_vm4, %v796_v56, 0 }
 0x44c   : > { %2481 = vrot.lane.b32.xlu1 %v2480_v25, %s2906_s16  ;;  %2247 = vmatmul.mubr.msk.bf16.vlgmr.msra.gmra.mrb[4].mxu1 %vm810_vm3, %v741_v24 }
 0x44d   : > { %2257 = vmatpush3.bf16.xpose.msra.mxu1 %v953_v27  ;;  %2258 = vmatprep.mubr.msk.bf16.mxu1 %vm2905_vm2, %v2904_v41  ;;  %v1350_v61 = vsel %vm1302_vm4, %v797_v57, 0 }
 0x44e   : > { %2262 = vmatprep.subr.bf16.mxu0 %v2904_v41  ;;  %2268 = vmatprep.subr.bf16.mxu1 %v2904_v41 }
 0x450   : > { %2486 = vrot.lane.b32.xlu1 %v2475_v62, %s2908_s26  ;;  %v804_v62 = vlaneseq }
 0x452   : > { %v805_v63 = vshrl.u32 %v804_v62, 7  ;;  %v807_v0 = vand.u32 127, %v804_v62 }
 0x454   : > { %2491 = vrot.lane.b32.xlu1 %v2480_v25, %s2908_s26  ;;  %vm808_vm5 = vcmp.le.s32.totalorder %v807_v0, %v805_v63 }
 0x455   : > { %v809_v2 = vsel %vm808_vm5, 0.0, %v2909_v1 }
 0x458   : > { %2501 = vrot.lane.b32.xlu1 %v2480_v25, %s2907_s22 }
 0x4be   : > { %v2482_v28 = vpop.permute.xlu1 %2481 }
 0x4bf   : > { %v2484_v29 = vunpack.i.h.bf16 %v2482_v28  ;;  %v2483_v30 = vunpack.i.l.bf16 %v2482_v28 }
 0x4c1   : > { %v743_v31 = vpack.c.bf16 %v2484_v29, %v2484_v29  ;;  %v742_v32 = vpack.c.bf16 %v2483_v30, %v2483_v30 }
 0x4c2   : > { %v2487_v33 = vpop.permute.xlu1 %2486 }
 0x4c3   : > { %v2489_v34 = vunpack.i.h.bf16 %v2487_v33  ;;  %v2488_v35 = vunpack.i.l.bf16 %v2487_v33  ;;  %2253 = vmatmul.mubr.msk.bf16.vlgmr.msra.gmra.mrb[8].mxu0 %vm810_vm3, %v742_v32  ;;  %2259 = vmatmul.mubr.msk.bf16.vlgmr.msra.gmra.mrb[8].mxu1 %vm810_vm3, %v743_v31 }
 0x4c4   : > { %2264 = vmatprep.mubr.msk.bf16.mxu0 %vm2905_vm2, %v2904_v41  ;;  %2270 = vmatprep.mubr.msk.bf16.mxu1 %vm2905_vm2, %v2904_v41 }
 0x4c5   : > { %v773_v37 = vpack.c.bf16 %v2489_v34, %v2489_v34  ;;  %v772_v38 = vpack.c.bf16 %v2488_v35, %v2488_v35 }
 0x4c6   : > { %v2492_v39 = vpop.permute.xlu1 %2491 }
 0x4c7   : > { %v999_v43 = vsel %vm810_vm3, %v772_v38, 0  ;;  %v1045_v44 = vsel %vm810_vm3, %v773_v37, 0  ;;  %v2494_v45 = vunpack.i.h.bf16 %v2492_v39  ;;  %v2493_v46 = vunpack.i.l.bf16 %v2492_v39 }
 0x4c8   : > { %2263 = vmatpush3.bf16.xpose.msra.mxu0 %v999_v43  ;;  %2269 = vmatpush3.bf16.xpose.msra.mxu1 %v1045_v44 }
 0x4c9   : > { %2274 = vmatprep.subr.bf16.mxu0 %v2904_v41  ;;  %2280 = vmatprep.subr.bf16.mxu1 %v2904_v41  ;;  %v745_v49 = vpack.c.bf16 %v2494_v45, %v2494_v45  ;;  %v744_v50 = vpack.c.bf16 %v2493_v46, %v2493_v46 }
 0x4ca   : > { %v2502_v51 = vpop.permute.xlu1 %2501 }
 0x4cb   : > { %v2504_v54 = vunpack.i.h.bf16 %v2502_v51  ;;  %v2503_v55 = vunpack.i.l.bf16 %v2502_v51 }
 0x4cd   : > { %v747_v58 = vpack.c.bf16 %v2504_v54, %v2504_v54  ;;  %v746_v59 = vpack.c.bf16 %v2503_v55, %v2503_v55 }
 0x4cf   : > { %2265 = vmatmul.mubr.msk.bf16.vlgmr.msra.gmra.mrb[12].mxu0 %vm810_vm3, %v744_v50  ;;  %2271 = vmatmul.mubr.msk.bf16.vlgmr.msra.gmra.mrb[12].mxu1 %vm810_vm3, %v745_v49 }
 0x4d0   : > { %2275 = vmatpush3.bf16.xpose.msra.mxu0 %v1091_v52  ;;  %2281 = vmatpush3.bf16.xpose.msra.mxu1 %v1137_v53 }
 0x4d1   : > { %2276 = vmatprep.mubr.msk.bf16.mxu0 %vm2905_vm2, %v2904_v41  ;;  %2282 = vmatprep.mubr.msk.bf16.mxu1 %vm2905_vm2, %v2904_v41 }
 0x4d2   : > { %2286 = vmatprep.subr.bf16.mxu0 %v2904_v41  ;;  %2292 = vmatprep.subr.bf16.mxu1 %v2904_v41 }
 0x4d7   : > { %2277 = vmatmul.mubr.msk.bf16.vlgmr.msra.gmra.mrb[16].mxu0 %vm810_vm3, %v746_v59  ;;  %2283 = vmatmul.mubr.msk.bf16.vlgmr.msra.gmra.mrb[16].mxu1 %vm810_vm3, %v747_v58 }
 0x4d8   : > { %2287 = vmatpush3.bf16.msra.mxu0 %v1304_v60  ;;  %2293 = vmatpush3.bf16.msra.mxu1 %v1350_v61 }
 0x4d9   : > { %2288 = vmatprep.mubr.msk.bf16.mxu0 %vm2905_vm2, %v2904_v41  ;;  %2294 = vmatprep.mubr.msk.bf16.mxu1 %vm2905_vm2, %v2904_v41 }
 0x4da   : > { %2298 = vmatprep.subr.bf16.mxu0 %v2904_v41  ;;  %2304 = vmatprep.subr.bf16.mxu1 %v2904_v41 }
 0x51d   : > { %v851_v3 = vpop.f32.mrb[4].mxu0 }
 0x51e   : > { %v852_v4 = vadd.f32 %v851_v3, %v809_v2  ;;  %v2242_v5 = vpop.f32.mrb[5].mxu0 }
 0x51f   : > { %v854_v6 = vpop.f32.mrb[6].mxu0  ;;  %v897_v7 = vpop.f32.mrb[4].mxu1 }
 0x520   : > { %v898_v8 = vadd.f32 %v897_v7, %v809_v2  ;;  %v2243_v9 = vpop.f32.mrb[7].mxu0  ;;  %v2248_v10 = vpop.f32.mrb[5].mxu1  ;;  %v1179_v11 = vsel %vm810_vm3, %v852_v4, -inf }
 0x521   : > { %v900_v12 = vpop.f32.mrb[6].mxu1  ;;  %1180 = vmax.xlane.f32.xlu0 %v1179_v11 }
 0x522   : > { %v2249_v13 = vpop.f32.mrb[7].mxu1  ;;  %v1182_v14 = vsel %vm810_vm3, %v898_v8, -inf }
 0x523   : > { %1183 = vmax.xlane.f32.xlu1 %v1182_v14 }
 0x596   : > { %v943_v15 = vpop.f32.mrb[8].mxu0  ;;  %v989_v16 = vpop.f32.mrb[8].mxu1 }
 0x597   : > { %v944_v17 = vadd.f32 %v943_v15, %v809_v2  ;;  %v2254_v18 = vpop.f32.mrb[9].mxu0  ;;  %v2260_v19 = vpop.f32.mrb[9].mxu1  ;;  %v990_v22 = vadd.f32 %v989_v16, %v809_v2 }
 0x598   : > { %v946_v20 = vpop.f32.mrb[10].mxu0  ;;  %v992_v21 = vpop.f32.mrb[10].mxu1 }
 0x599   : > { %v2255_v23 = vpop.f32.mrb[11].mxu0  ;;  %v2261_v24 = vpop.f32.mrb[11].mxu1  ;;  %v1185_v25 = vsel %vm810_vm3, %v944_v17, -inf  ;;  %v1188_v27 = vsel %vm810_vm3, %v990_v22, -inf }
 0x59a   : > { %1186 = vmax.xlane.f32.xlu0 %v1185_v25 }
 0x59e   : > { %1189 = vmax.xlane.f32.xlu0 %v1188_v27 }
 0x5a2   : > { %v1035_v28 = vpop.f32.mrb[12].mxu0  ;;  %v1081_v29 = vpop.f32.mrb[12].mxu1 }
 0x5a3   : > { %v1036_v30 = vadd.f32 %v1035_v28, %v809_v2  ;;  %v1082_v31 = vadd.f32 %v1081_v29, %v809_v2  ;;  %v2266_v32 = vpop.f32.mrb[13].mxu0  ;;  %v2272_v33 = vpop.f32.mrb[13].mxu1 }
 0x5a4   : > { %v1038_v34 = vpop.f32.mrb[14].mxu0  ;;  %v1084_v35 = vpop.f32.mrb[14].mxu1 }
 0x5a5   : > { %v2267_v36 = vpop.f32.mrb[15].mxu0  ;;  %v2273_v37 = vpop.f32.mrb[15].mxu1  ;;  %v1194_v38 = vsel %vm810_vm3, %v1082_v31, -inf  ;;  %v1191_v39 = vsel %vm810_vm3, %v1036_v30, -inf }
 0x5a6   : > { %1195 = vmax.xlane.f32.xlu1 %v1194_v38  ;;  %1192 = vmax.xlane.f32.xlu0 %v1191_v39 }
 0x5aa   : > { %v1127_v40 = vpop.f32.mrb[16].mxu0  ;;  %v1173_v42 = vpop.f32.mrb[16].mxu1 }
 0x5ab   : > { %v1128_v43 = vadd.f32 %v1127_v40, %v809_v2  ;;  %v3421_v44 = vadd.f32 %v1173_v42, %v809_v2  ;;  %v2278_v45 = vpop.f32.mrb[17].mxu0  ;;  %v2284_v46 = vpop.f32.mrb[17].mxu1 }
 0x5ac   : > { %v1130_v47 = vpop.f32.mrb[18].mxu0  ;;  %v1176_v48 = vpop.f32.mrb[18].mxu1 }
 0x5ad   : > { %v2279_v49 = vpop.f32.mrb[19].mxu0  ;;  %v2285_v50 = vpop.f32.mrb[19].mxu1  ;;  %v1200_v51 = vsel %vm810_vm3, %v3421_v44, -inf  ;;  %v1197_v52 = vsel %vm810_vm3, %v1128_v43, -inf }
 0x5ae   : > { %1201 = vmax.xlane.f32.xlu1 %v1200_v51  ;;  %v1181_v53 = vpop.xlane.xlu0 %1180  ;;  %1198 = vmax.xlane.f32.xlu0 %v1197_v52 }
 0x5af   : > { %v1203_v54 = vsub.f32 %v852_v4, %v1181_v53 }
 0x5b0   : > { %v1184_v55 = vpop.xlane.xlu1 %1183 }
 0x5b1   : > { %v1211_v56 = vmul.f32 1.442695, %v1203_v54  ;;  %v1204_v57 = vsub.f32 %v898_v8, %v1184_v55 }
 0x5b3   : > { %2549 = vpow2.f32 %v1211_v56  ;;  %v1213_v58 = vmul.f32 1.442695, %v1204_v57 }
 0x5b5   : > { %2551 = vpow2.f32 %v1213_v58 }
 0x5bd   : > { %v2550_v59 = vpop.eup %2549 }
 0x5be   : > { %v1227_v60 = vsel %vm810_vm3, %v2550_v59, 0.0 }
 0x5bf   : > { %v2552_v61 = vpop.eup %2551  ;;  %1228 = vadd.xlane.f32.xlu0 %v1227_v60 }
 0x5c0   : > { %v1230_v62 = vsel %vm810_vm3, %v2552_v61, 0.0 }
 0x5c1   : > { %1231 = vadd.xlane.f32.xlu1 %v1230_v62 }
 0x627   : > { %v1187_v63 = vpop.xlane.xlu0 %1186 }
 0x628   : > { %v1205_v0 = vsub.f32 %v944_v17, %v1187_v63 }
 0x62a   : > { %v1215_v1 = vmul.f32 1.442695, %v1205_v0 }
 0x62b   : > { %v1190_v2 = vpop.xlane.xlu0 %1189 }
 0x62c   : > { %2553 = vpow2.f32 %v1215_v1  ;;  %v1206_v3 = vsub.f32 %v990_v22, %v1190_v2 }
 0x62e   : > { %v1217_v4 = vmul.f32 1.442695, %v1206_v3 }
 0x630   : > { %2555 = vpow2.f32 %v1217_v4 }
 0x633   : > { %v1196_v5 = vpop.xlane.xlu1 %1195  ;;  %v1193_v6 = vpop.xlane.xlu0 %1192 }
 0x634   : > { %v1208_v7 = vsub.f32 %v1082_v31, %v1196_v5  ;;  %v1207_v8 = vsub.f32 %v1036_v30, %v1193_v6 }
 0x636   : > { %v3428_v9 = vpop.eup %2553  ;;  %v1221_v10 = vmul.f32 1.442695, %v1208_v7  ;;  %v1219_v11 = vmul.f32 1.442695, %v1207_v8 }
 0x637   : > { %v1233_v12 = vsel %vm810_vm3, %v3428_v9, 0.0 }
 0x638   : > { %2557 = vpow2.f32 %v1221_v10  ;;  %1234 = vadd.xlane.f32.xlu0 %v1233_v12 }
 0x639   : > { %2559 = vpow2.f32 %v1219_v11 }
 0x63a   : > { %v3432_v13 = vpop.eup %2555 }
 0x63b   : > { %v1199_v14 = vpop.xlane.xlu0 %1198  ;;  %v1236_v15 = vsel %vm810_vm3, %v3432_v13, 0.0  ;;  %v1202_v22 = vpop.xlane.xlu1 %1201 }
 0x63c   : > { %v1209_v16 = vsub.f32 %v1128_v43, %v1199_v14  ;;  %1237 = vadd.xlane.f32.xlu1 %v1236_v15  ;;  %v1210_v40 = vsub.f32 %v3421_v44, %v1202_v22 }
 0x63e   : > { %v1223_v17 = vmul.f32 1.442695, %v1209_v16  ;;  %v1225_v42 = vmul.f32 1.442695, %v1210_v40 }
 0x640   : > { %2561 = vpow2.f32 %v1223_v17 }
 0x642   : > { %v3436_v18 = vpop.eup %2557 }
 0x643   : > { %v3438_v19 = vpop.eup %2559  ;;  %v1242_v20 = vsel %vm810_vm3, %v3436_v18, 0.0 }
 0x644   : > { %1243 = vadd.xlane.f32.xlu1 %v1242_v20  ;;  %v1239_v21 = vsel %vm810_vm3, %v3438_v19, 0.0 }
 0x645   : > { %1240 = vadd.xlane.f32.xlu0 %v1239_v21 }
 0x64a   : > { %v3444_v23 = vpop.eup %2561 }
 0x64b   : > { %v1245_v24 = vsel %vm810_vm3, %v3444_v23, 0.0 }
 0x64c   : > { %v1229_v25 = vpop.xlane.xlu0 %1228  ;;  %1246 = vadd.xlane.f32.xlu0 %v1245_v24 }
 0x64d   : > { %2563 = vrcp.f32 %v1229_v25 }
 0x64e   : > { %v1232_v27 = vpop.xlane.xlu1 %1231 }
 0x64f   : > { %2565 = vrcp.f32 %v1232_v27 }
 0x650   : > { %2567 = vpow2.f32 %v1225_v42 }
 0x655   : > { %2511 = vrot.lane.b32.xlu1 %v3369_v26, %s2908_s26 }
 0x657   : > { %v2564_v28 = vpop.eup %2563 }
 0x658   : > { %v1259_v29 = vmul.f32 %v2564_v28, %v1229_v25 }
 0x659   : > { %v2566_v30 = vpop.eup %2565 }
 0x65a   : > { %v1267_v31 = vsub.f32 2.0, %v1259_v29  ;;  %v1260_v32 = vmul.f32 %v2566_v30, %v1232_v27  ;;  %v3459_v43 = vpop.eup %2567 }
 0x65b   : > { %v1248_v45 = vsel %vm810_vm3, %v3459_v43, 0.0 }
 0x65c   : > { %v1275_v33 = vmul.f32 %v2564_v28, %v1267_v31  ;;  %v1268_v34 = vsub.f32 2.0, %v1260_v32 }
 0x65e   : > { %v1283_v35 = vmul.f32 %v2550_v59, %v1275_v33  ;;  %v1276_v36 = vmul.f32 %v2566_v30, %v1268_v34 }
 0x660   : > { %v1291_v37 = vpack.c.bf16 %v1283_v35, %v1283_v35  ;;  %v1284_v38 = vmul.f32 %v2552_v61, %v1276_v36 }
 0x662   : > { %v1292_v39 = vpack.c.bf16 %v1284_v38, %v1284_v38  ;;  %2289 = vmatmul.mubr.msk.bf16.vlgmr.msra.gmra.mrb[20].mxu0 %vm810_vm3, %v1291_v37  ;;  %2506 = vrot.lane.b32.xlu0 %v3369_v26, %s2906_s16 }
 0x663   : > { %2300 = vmatprep.mubr.msk.bf16.mxu0 %vm2905_vm2, %v2904_v41 }
 0x664   : > { %2295 = vmatmul.mubr.msk.bf16.vlgmr.msra.gmra.mrb[20].mxu1 %vm810_vm3, %v1292_v39 }
 0x665   : > { %2306 = vmatprep.mubr.msk.bf16.mxu1 %vm2905_vm2, %v2904_v41 }
 0x679   : > { %1249 = vadd.xlane.f32.xlu1 %v1248_v45 }
 0x68a   : > { %2516 = vrot.lane.b32.xlu1 %v3369_v26, %s2907_s22 }
 0x6c5   : > { %v1235_v44 = vpop.xlane.xlu0 %1234 }
 0x6c6   : > { %2569 = vrcp.f32 %v1235_v44 }
 0x6c9   : > { %v1238_v46 = vpop.xlane.xlu1 %1237 }
 0x6ca   : > { %2571 = vrcp.f32 %v1238_v46 }
 0x6d0   : > { %v2570_v47 = vpop.eup %2569 }
 0x6d1   : > { %v1244_v48 = vpop.xlane.xlu1 %1243  ;;  %v1261_v51 = vmul.f32 %v2570_v47, %v1235_v44 }
 0x6d2   : > { %2573 = vrcp.f32 %v1244_v48  ;;  %v1241_v49 = vpop.xlane.xlu0 %1240 }
 0x6d3   : > { %2575 = vrcp.f32 %v1241_v49  ;;  %v1269_v53 = vsub.f32 2.0, %v1261_v51 }
 0x6d4   : > { %v2572_v50 = vpop.eup %2571 }
 0x6d5   : > { %v1262_v52 = vmul.f32 %v2572_v50, %v1238_v46  ;;  %v1277_v57 = vmul.f32 %v2570_v47, %v1269_v53  ;;  %v2512_v59 = vpop.permute.xlu1 %2511 }
 0x6d6   : > { %v2514_v63 = vunpack.i.h.bf16 %v2512_v59  ;;  %v2513_v0 = vunpack.i.l.bf16 %v2512_v59 }
 0x6d7   : > { %v1270_v54 = vsub.f32 2.0, %v1262_v52  ;;  %v1285_v3 = vmul.f32 %v3428_v9, %v1277_v57 }
 0x6d8   : > { %v801_v10 = vpack.c.bf16 %v2514_v63, %v2514_v63  ;;  %v800_v11 = vpack.c.bf16 %v2513_v0, %v2513_v0 }
 0x6d9   : > { %v1247_v55 = vpop.xlane.xlu0 %1246  ;;  %v1278_v58 = vmul.f32 %v2572_v50, %v1270_v54  ;;  %v1293_v15 = vpack.c.bf16 %v1285_v3, %v1285_v3 }
 0x6da   : > { %v1488_v9 = vsel %vm1302_vm4, %v800_v11, 0  ;;  %2577 = vrcp.f32 %v1247_v55 }
 0x6db   : > { %v1286_v4 = vmul.f32 %v3432_v13, %v1278_v58  ;;  %v1534_v13 = vsel %vm1302_vm4, %v801_v10, 0  ;;  %v2540_v10 = vld [vmem:[%s448_s24 + $0x8] sm:$0xff]  }
 0x6dc   : > { %v2574_v56 = vpop.eup %2573 }
 0x6dd   : > { %v2576_v26 = vpop.eup %2575  ;;  %v1264_v60 = vmul.f32 %v2574_v56, %v1244_v48  ;;  %v2507_v62 = vpop.permute.xlu0 %2506  ;;  %v1294_v16 = vpack.c.bf16 %v1286_v4, %v1286_v4 }
 0x6de   : > { %v1263_v61 = vmul.f32 %v2576_v26, %v1241_v49  ;;  %v2509_v1 = vunpack.i.h.bf16 %v2507_v62  ;;  %v2508_v2 = vunpack.i.l.bf16 %v2507_v62 }
 0x6df   : > { %v1272_v5 = vsub.f32 2.0, %v1264_v60 }
 0x6e0   : > { %v1271_v6 = vsub.f32 2.0, %v1263_v61  ;;  %v799_v7 = vpack.c.bf16 %v2509_v1, %v2509_v1  ;;  %v798_v8 = vpack.c.bf16 %v2508_v2, %v2508_v2 }
 0x6e1   : > { %v1280_v17 = vmul.f32 %v2574_v56, %v1272_v5  ;;  %v2539_v56 = vld [vmem:[%s448_s24] sm:$0xff]  }
 0x6e2   : > { %v1396_v12 = vsel %vm1302_vm4, %v798_v8, 0  ;;  %v1442_v14 = vsel %vm1302_vm4, %v799_v7, 0  ;;  %v1279_v20 = vmul.f32 %v2576_v26, %v1271_v6 }
 0x6e3   : > { %2299 = vmatpush3.bf16.msra.mxu0 %v1396_v12  ;;  %2305 = vmatpush3.bf16.msra.mxu1 %v1442_v14  ;;  %v1288_v21 = vmul.f32 %v3436_v18, %v1280_v17 }
 0x6e4   : > { %2310 = vmatprep.subr.bf16.mxu0 %v2904_v41  ;;  %2316 = vmatprep.subr.bf16.mxu1 %v2904_v41  ;;  %v1287_v22 = vmul.f32 %v3438_v19, %v1279_v20  ;;  %v2578_v18 = vpop.eup %2577 }
 0x6e5   : > { %v1296_v24 = vpack.c.bf16 %v1288_v21, %v1288_v21  ;;  %v1265_v19 = vmul.f32 %v2578_v18, %v1247_v55 }
 0x6e6   : > { %2301 = vmatmul.mubr.msk.bf16.vlgmr.msra.gmra.mrb[24].mxu0 %vm810_vm3, %v1293_v15  ;;  %2307 = vmatmul.mubr.msk.bf16.vlgmr.msra.gmra.mrb[24].mxu1 %vm810_vm3, %v1294_v16  ;;  %v1295_v25 = vpack.c.bf16 %v1287_v22, %v1287_v22 }
 0x6e7   : > { %2311 = vmatpush3.bf16.msra.mxu0 %v1488_v9  ;;  %2317 = vmatpush3.bf16.msra.mxu1 %v1534_v13  ;;  %v1273_v27 = vsub.f32 2.0, %v1265_v19 }
 0x6e8   : > { %2312 = vmatprep.mubr.msk.bf16.mxu0 %vm2905_vm2, %v2904_v41  ;;  %2318 = vmatprep.mubr.msk.bf16.mxu1 %vm2905_vm2, %v2904_v41 }
 0x6e9   : > { %2322 = vmatprep.subr.bf16.mxu0 %v2904_v41  ;;  %2328 = vmatprep.subr.bf16.mxu1 %v2904_v41  ;;  %v1281_v29 = vmul.f32 %v2578_v18, %v1273_v27 }
 0x6eb   : > { %v1289_v33 = vmul.f32 %v3444_v23, %v1281_v29 }
 0x6ed   : > { %v1297_v39 = vpack.c.bf16 %v1289_v33, %v1289_v33 }
 0x6ee   : > { %2313 = vmatmul.mubr.msk.bf16.vlgmr.msra.gmra.mrb[28].mxu0 %vm810_vm3, %v1295_v25  ;;  %2319 = vmatmul.mubr.msk.bf16.vlgmr.msra.gmra.mrb[28].mxu1 %vm810_vm3, %v1296_v24 }
 0x6ef   : > { %2324 = vmatprep.mubr.msk.bf16.mxu0 %vm2905_vm2, %v2904_v41  ;;  %2330 = vmatprep.mubr.msk.bf16.mxu1 %vm2905_vm2, %v2904_v41 }
 0x706   : > { %v1250_v28 = vpop.xlane.xlu1 %1249 }
 0x707   : > { %2579 = vrcp.f32 %v1250_v28 }
 0x70a   : > { %v2517_v30 = vpop.permute.xlu1 %2516 }
 0x70b   : > { %v2519_v31 = vunpack.i.h.bf16 %v2517_v30  ;;  %v2518_v32 = vunpack.i.l.bf16 %v2517_v30 }
 0x70d   : > { %v803_v34 = vpack.c.bf16 %v2519_v31, %v2519_v31  ;;  %v802_v35 = vpack.c.bf16 %v2518_v32, %v2518_v32 }
 0x70f   : > { %v1580_v36 = vsel %vm1302_vm4, %v802_v35, 0  ;;  %v1626_v37 = vsel %vm1302_vm4, %v803_v34, 0  ;;  %v2541_v35 = vld [vmem:[%s3312_s19] sm:$0xff]  }
 0x710   : > { %2323 = vmatpush3.bf16.msra.mxu0 %v1580_v36  ;;  %2329 = vmatpush3.bf16.msra.mxu1 %v1626_v37  ;;  %v2542_v36 = vld [vmem:[%s3312_s19 + $0x8] sm:$0xff]   ;;  %v2543_v37 = vld [vmem:[%s3312_s19 + $0x10] sm:$0xff]  }
 0x711   : > { %v2580_v38 = vpop.eup %2579  ;;  %2334 = vmatprep.subr.bf16.mxu0 %v2904_v41  ;;  %2342 = vmatprep.subr.bf16.mxu1 %v2904_v41 }
 0x712   : > { %v1266_v40 = vmul.f32 %v2580_v38, %v1250_v28 }
 0x713   : > { %2325 = vmatmul.mubr.msk.bf16.vlgmr.msra.gmra.mrb[32].mxu0 %vm810_vm3, %v1297_v39  ;;  %v2157_v39 = vld [vmem:[%s421_s5] ss:$0 sm:$0xff] }
 0x714   : > { %v1274_v42 = vsub.f32 2.0, %v1266_v40  ;;  %2338 = vmatprep.mubr.msk.bf16.mxu0 %vm2905_vm2, %v2904_v41  ;;  %2335 = vmatpush3.bf16.msra.mxu0 %v2539_v56 }
 0x715   : > { %2336 = vmatprep.subr.bf16.mxu0 %v2904_v41 }
 0x716   : > { %v1282_v23 = vmul.f32 %v2580_v38, %v1274_v42  ;;  %v2544_v38 = vld [vmem:[%s3312_s19 + $0x18] sm:$0xff]  }
 0x718   : > { %v1290_v45 = vmul.f32 %v3459_v43, %v1282_v23  ;;  %2337 = vmatpush3.bf16.msra.mxu0 %v2540_v10 }
 0x71a   : > { %v1298_v44 = vpack.c.bf16 %v1290_v45, %v1290_v45 }
 0x71c   : > { %2331 = vmatmul.mubr.msk.bf16.vlgmr.msra.gmra.mrb[32].mxu1 %vm810_vm3, %v1298_v44 }
 0x71d   : > { %2350 = vmatprep.mubr.msk.bf16.mxu1 %vm2905_vm2, %v2904_v41  ;;  %2343 = vmatpush3.bf16.msra.mxu1 %v2541_v35 }
 0x71e   : > { %2344 = vmatprep.subr.bf16.mxu1 %v2904_v41 }
 0x721   : > { %2345 = vmatpush3.bf16.msra.mxu1 %v2542_v36 }
 0x722   : > { %2346 = vmatprep.subr.bf16.mxu1 %v2904_v41 }
 0x725   : > { %2347 = vmatpush3.bf16.msra.mxu1 %v2543_v37 }
 0x726   : > { %2348 = vmatprep.subr.bf16.mxu1 %v2904_v41 }
 0x729   : > { %2349 = vmatpush3.bf16.msra.mxu1 %v2544_v38 }
 0x735   : > { %v1340_v46 = vpop.f32.mrb[20].mxu0 }
 0x736   : > { %v2290_v47 = vpop.f32.mrb[21].mxu0 }
 0x737   : > { %v1343_v48 = vpop.f32.mrb[22].mxu0  ;;  %v1386_v49 = vpop.f32.mrb[20].mxu1 }
 0x738   : > { %v2291_v50 = vpop.f32.mrb[23].mxu0  ;;  %v2296_v51 = vpop.f32.mrb[21].mxu1 }
 0x739   : > { %v1389_v52 = vpop.f32.mrb[22].mxu1 }
 0x73a   : > { %v2297_v53 = vpop.f32.mrb[23].mxu1 }
 0x7b9   : > { %v1432_v54 = vpop.f32.mrb[24].mxu0  ;;  %v1478_v55 = vpop.f32.mrb[24].mxu1 }
 0x7ba   : > { %v2520_v57 = vpack.i.bf16 %v1478_v55, %v1432_v54  ;;  %v2302_v43 = vpop.f32.mrb[25].mxu0  ;;  %v2308_v58 = vpop.f32.mrb[25].mxu1 }
 0x7bb   : > { %v1435_v59 = vpop.f32.mrb[26].mxu0  ;;  %v1481_v26 = vpop.f32.mrb[26].mxu1 }
 0x7bc   : > { %v2309_v60 = vpop.f32.mrb[27].mxu1  ;;  %2521 = vrot.lane.b32.xlu1 %v2520_v57, %s2910_s29  ;;  %v2303_v61 = vpop.f32.mrb[27].mxu0 }
 0x7c1   : > { %v1524_v62 = vpop.f32.mrb[28].mxu0  ;;  %v1570_v63 = vpop.f32.mrb[28].mxu1 }
 0x7c2   : > { %v2525_v0 = vpack.i.bf16 %v1570_v63, %v1524_v62  ;;  %v2314_v1 = vpop.f32.mrb[29].mxu0  ;;  %v2320_v2 = vpop.f32.mrb[29].mxu1 }
 0x7c3   : > { %v1527_v3 = vpop.f32.mrb[30].mxu0  ;;  %v1573_v4 = vpop.f32.mrb[30].mxu1 }
 0x7c4   : > { %v2321_v5 = vpop.f32.mrb[31].mxu1  ;;  %2526 = vrot.lane.b32.xlu0 %v2525_v0, %s2911_s15  ;;  %v2315_v6 = vpop.f32.mrb[31].mxu0 }
 0x7e6   : > { %v1616_v7 = vpop.f32.mrb[32].mxu0 }
 0x7e7   : > { %v2326_v8 = vpop.f32.mrb[33].mxu0 }
 0x7e8   : > { %v1619_v11 = vpop.f32.mrb[34].mxu0 }
 0x7e9   : > { %v2327_v12 = vpop.f32.mrb[35].mxu0 }
 0x7ef   : > { %v1662_v14 = vpop.f32.mrb[32].mxu1 }
 0x7f0   : > { %v2530_v15 = vpack.i.bf16 %v1662_v14, %v1616_v7  ;;  %v2332_v16 = vpop.f32.mrb[33].mxu1 }
 0x7f1   : > { %v1665_v17 = vpop.f32.mrb[34].mxu1 }
 0x7f2   : > { %v2333_v20 = vpop.f32.mrb[35].mxu1  ;;  %2531 = vrot.lane.b32.xlu1 %v2530_v15, %s2912_s21 }
 0x82e   : > { %v2522_v9 = vpop.permute.xlu1 %2521 }
 0x82f   : > { %v2524_v21 = vunpack.i.h.bf16 %v2522_v9  ;;  %v2523_v22 = vunpack.i.l.bf16 %v2522_v9 }
 0x831   : > { %v1693_v19 = vsel %vm810_vm3, %v1386_v49, %v2524_v21  ;;  %v1692_v27 = vsel %vm810_vm3, %v1340_v46, %v2523_v22 }
 0x836   : > { %v2527_v13 = vpop.permute.xlu0 %2526 }
 0x837   : > { %v2529_v24 = vunpack.i.h.bf16 %v2527_v13  ;;  %v2528_v25 = vunpack.i.l.bf16 %v2527_v13  ;;  %v2913_v13 = vmov -1.0  }
 0x839   : > { %v1696_v30 = vsel %vm1694_vm6, %v1693_v19, %v2529_v24  ;;  %v1695_v31 = vsel %vm1694_vm6, %v1692_v27, %v2528_v25 }
 0x864   : > { %v2532_v18 = vpop.permute.xlu1 %2531 }
 0x865   : > { %v2534_v28 = vunpack.i.h.bf16 %v2532_v18  ;;  %v2533_v29 = vunpack.i.l.bf16 %v2532_v18 }
 0x867   : > { %v1699_v32 = vsel %vm1697_vm7, %v1696_v30, %v2534_v28  ;;  %v1698_v33 = vsel %vm1697_vm7, %v1695_v31, %v2533_v29 }
 0x868   : > { %v1701_v34 = vpack.c.bf16 %v1699_v32, %v1698_v33 }
 0x86a   : > { %2339 = vmatmul.mubr.msk.bf16.vlgmr.msra.gmra.mrb[36].mxu0 %vm554_vm1, %v1701_v34  ;;  %v2161_v34 = vld [vmem:[%s3290_s1 + $0x4] ss:$0 sm:$0xff] }
 0x93d   : > { %v1761_v40 = vpop.f32.mrb[36].mxu0 }
 0x93e   : > { %v1762_v42 = vadd.f32 %v2157_v39, %v1761_v40  ;;  %v2340_v23 = vpop.f32.mrb[37].mxu0 }
 0x93f   : > { %v1764_v45 = vpop.f32.mrb[38].mxu0 }
 0x940   : > { %v1770_v44 = vmul.f32 0.70710677, %v1762_v42  ;;  %v1765_v46 = vadd.f32 %v2157_v39, %v1764_v45  ;;  %v2341_v47 = vpop.f32.mrb[39].mxu0  ;;  %v1768_v28 = vmul.f32 0.5, %v1762_v42  ;;  %v2589_v39 = vld [vmem:[#allocation2] sm:$0xff] }
 0x942   : > { %v1776_v48 = vand.u32 2147483647, %v1770_v44  ;;  %v1771_v49 = vmul.f32 0.70710677, %v1765_v46  ;;  %vm1772_vm8 = vcmp.ge.f32.partialorder %v1770_v44, 0.0  ;;  %v1769_v29 = vmul.f32 0.5, %v1765_v46 }
 0x943   : > { %v1774_v21 = vsel %vm1772_vm8, 1.0, %v2913_v13  ;;  %v2590_v44 = vld [vmem:[#allocation2 + $0x8] sm:$0xff] }
 0x944   : > { %v1778_v50 = vmul.f32 0.3275911, %v1776_v48  ;;  %v1777_v51 = vand.u32 2147483647, %v1771_v49  ;;  %v1802_v41 = vsub.f32 0.0, %v1776_v48  ;;  %vm1773_vm9 = vcmp.ge.f32.partialorder %v1771_v49, 0.0 }
 0x945   : > { %v1775_v18 = vsel %vm1773_vm9, 1.0, %v2913_v13 }
 0x946   : > { %v1780_v52 = vadd.f32 1.0, %v1778_v50  ;;  %v1779_v53 = vmul.f32 0.3275911, %v1777_v51  ;;  %v1803_v55 = vsub.f32 0.0, %v1777_v51  ;;  %v1804_v57 = vmul.f32 %v1802_v41, %v1776_v48 }
 0x948   : > { %2581 = vrcp.f32 %v1780_v52  ;;  %v1781_v54 = vadd.f32 1.0, %v1779_v53  ;;  %v1805_v26 = vmul.f32 %v1803_v55, %v1777_v51  ;;  %v1806_v60 = vmul.f32 1.442695, %v1804_v57 }
 0x94a   : > { %2583 = vrcp.f32 %v1781_v54  ;;  %v1808_v1 = vmul.f32 1.442695, %v1805_v26 }
 0x94b   : > { %2585 = vpow2.f32 %v1806_v60 }
 0x94c   : > { %2587 = vpow2.f32 %v1808_v1 }
 0x952   : > { %v2582_v56 = vpop.eup %2581 }
 0x953   : > { %v1784_v43 = vmul.f32 1.0614054, %v2582_v56 }
 0x954   : > { %v2584_v58 = vpop.eup %2583 }
 0x955   : > { %v1786_v59 = vadd.f32 -1.4531521, %v1784_v43  ;;  %v1785_v61 = vmul.f32 1.0614054, %v2584_v58  ;;  %v2586_v14 = vpop.eup %2585 }
 0x956   : > { %v2588_v20 = vpop.eup %2587 }
 0x957   : > { %v1788_v62 = vmul.f32 %v2582_v56, %v1786_v59  ;;  %v1787_v63 = vadd.f32 -1.4531521, %v1785_v61 }
 0x959   : > { %v1790_v0 = vadd.f32 1.4214138, %v1788_v62  ;;  %v1789_v2 = vmul.f32 %v2584_v58, %v1787_v63 }
 0x95b   : > { %v1792_v3 = vmul.f32 %v2582_v56, %v1790_v0  ;;  %v1791_v4 = vadd.f32 1.4214138, %v1789_v2 }
 0x95d   : > { %v1794_v5 = vadd.f32 -0.28449672, %v1792_v3  ;;  %v1793_v6 = vmul.f32 %v2584_v58, %v1791_v4 }
 0x95f   : > { %v1796_v7 = vmul.f32 %v2582_v56, %v1794_v5  ;;  %v1795_v8 = vadd.f32 -0.28449672, %v1793_v6 }
 0x961   : > { %v1798_v10 = vadd.f32 0.2548296, %v1796_v7  ;;  %v1797_v11 = vmul.f32 %v2584_v58, %v1795_v8 }
 0x963   : > { %v1800_v12 = vmul.f32 %v2582_v56, %v1798_v10  ;;  %v1799_v15 = vadd.f32 0.2548296, %v1797_v11 }
 0x965   : > { %v1810_v16 = vmul.f32 %v2586_v14, %v1800_v12  ;;  %v1801_v17 = vmul.f32 %v2584_v58, %v1799_v15 }
 0x967   : > { %v1812_v9 = vsub.f32 1.0, %v1810_v16  ;;  %v1811_v22 = vmul.f32 %v2588_v20, %v1801_v17 }
 0x969   : > { %v1814_v24 = vmul.f32 %v1812_v9, %v1774_v21  ;;  %v1813_v25 = vsub.f32 1.0, %v1811_v22 }
 0x96b   : > { %v1816_v19 = vadd.f32 1.0, %v1814_v24  ;;  %v1815_v27 = vmul.f32 %v1813_v25, %v1775_v18 }
 0x96d   : > { %v1817_v30 = vadd.f32 1.0, %v1815_v27  ;;  %v1818_v31 = vmul.f32 %v1816_v19, %v1768_v28 }
 0x96f   : > { %v1819_v32 = vmul.f32 %v1817_v30, %v1769_v29 }
 0x971   : > { %v1820_v33 = vpack.c.bf16 %v1819_v32, %v1818_v31 }
 0x973   : > { %2351 = vmatmul.mubr.msk.bf16.vlgmr.msra.gmra.mrb[36].mxu1 %vm1857_vm10, %v1820_v33 }
 0xa46   : > { %v1895_v35 = vpop.f32.mrb[36].mxu1 }
 0xa47   : > { %v1896_v36 = vadd.f32 %v2161_v34, %v1895_v35  ;;  %v2352_v37 = vpop.f32.mrb[37].mxu1  ;;  %1909 = sbr.rel (%p2167_p8) target bundleno = 2646 (0xa56), region = 84 }
 0xa48   : > { %v1898_v38 = vpop.f32.mrb[38].mxu1 }
 0xa49   : > { %v1902_v40 = vadd.f32 %v2589_v39, %v1896_v36  ;;  %v1899_v23 = vadd.f32 %v2161_v34, %v1898_v38  ;;  %v2353_v45 = vpop.f32.mrb[39].mxu1 }
 0xa4b   : > { %1904 = vst.msk [vmem:[#allocation2] sm:$0xff] %vm554_vm1, %v1902_v40  ;;  %v1903_v42 = vadd.f32 %v2590_v44, %v1899_v23 }
 0xa4d   : > { %1905 = vst.msk [vmem:[#allocation2 + $0x8] sm:$0xff] %vm554_vm1, %v1903_v42 }
 0xa52   : > { %v1910_v46 = vld [vmem:[#allocation2] sm:$0xff] }
 0xa53   : > { %1912 = vst.msk [vmem:[#allocation15] sm:$0xff] %vm554_vm1, %v1910_v46 }
 0xa54   : > { %v1911_v47 = vld [vmem:[#allocation2 + $0x8] sm:$0xff] }
 0xa55   : > { %1913 = vst.msk [vmem:[#allocation15 + $0x8] sm:$0xff] %vm554_vm1, %v1911_v47 }
 0xa56 PF: > { %p2400_p9 = scmp.eq.s32.totalorder %s3128_s30, 1  ;;  %s2914_s9 = smov [#allocation15]  }
 0xa57   : > { %s1923_s3 = sshll.u32 %s2914_s9, 4  ;;  %s1924_s3 = int_to_ptr.vmem [resolvable:$true] %s1923_s3 }
 0xa58   : > { %s2799_s18 = scalar_lea.vmem %s1924_s3, 256  ;;  %p2806_p5 = scmp.lt.s32.totalorder %s1924_s3, %s1924_s3 }
 0xa59   : > { %p2800_p13 = scmp.ne.s32.totalorder %s1924_s3, %s2799_s18  ;;  %p2807_p2 = scmp.lt.s32.totalorder %s2799_s18, %s2799_s18 }
 0xa5b   : > { %p2801_p7 = pnand %p2800_p13, %p2400_p9  ;;  %p2808_p12 = por %p2807_p2, %p2806_p5 }
 0xa5d   : > { %p2802_p4 = pneg %p2801_p7 }
 0xa5f   : > { %p2809_p1 = pnand %p2808_p12, %p2802_p4 }
 0xa61   : > { %2812 = shalt.err (!%p2809_p1)
}
 0xa62   : > { %s2813_s10 = scalar_lea.hbm %s3574_s7, 256 }
 0xa63   : > { %p2814_p3 = scmp.ne.s32.totalorder %s3574_s7, %s2813_s10  ;;  %p2819_p6 = scmp.lt.u32.totalorder %s2813_s10, %s3574_s7 }
 0xa65   : > { %p2815_p11 = pnand %p2814_p3, %p2400_p9 }
 0xa67   : > { %p2816_p0 = pneg %p2815_p11 }
 0xa69   : > { %p2821_p10 = pnand %p2819_p6, %p2816_p0 }
 0xa6b   : > { %2824 = shalt.err (!%p2821_p10)
}
 0xa6c   : > { %s2915_s13 = smov 128  }
 0xa6d   : > { %2371 = dma.vmem_to_hbm [thread:$0]  (%p2400_p9), %s1924_s3, 256, %s3574_s7, [#allocation5], %s2915_s13, %s2915_s13, %s2910_s29  }
 0xa6e   : > { %2866 = dma.done.wait (%p2400_p9), [#allocation5], 256  }
 0xa6f   : > { %2868 = vsyncadd (%p2400_p9), [#allocation5], 4294967040 }
 0xa70 PF: > { %s3619_s12 = sld [smem:[#allocation22_spill]]  ;;  %s3620_s11 = sld [smem:[#allocation21_spill]] }
 0xa71   : > { %s3621_s26 = sld [smem:[#allocation24_spill]]  ;;  %s3622_s19 = sld [smem:[#allocation23_spill]] }
 0xa72   : > { %s3623_s24 = smov %s2875_s25  ;;  %s3625_s27 = smov %s2887_s28 }
 0xa76   : > { %s28_s29 = sadd.s32 1, %s3619_s12   ;;  %s3624_s25 = smov %s3620_s11 }
 0xa77   : > { %p25_p8 = scmp.ge.s32.totalorder %s28_s29, 4   ;;  %s3626_s28 = smov %s3622_s19 }
 0xa79   :  { %27 = sbr.rel (!%p25_p8) target bundleno = 14 (0xe), region = 159 }
 0xa80   :  { %1939 = vsyncpa [#allocation4], 1 }
 0xa81   :  { %1941 = vsyncpa [#allocation4 + $0x1], 1 }
 0xa82   :  { %1942 = vsyncpa [#allocation7], 1 }
 0xa83   :  { %1944 = vsyncpa [#allocation7 + $0x1], 1 }
 0xa84   :  { %1945 = vsyncpa [#allocation10], 1 }
 0xa85   :  { %1947 = vsyncpa [#allocation10 + $0x1], 1 }
 0xa86   :  { %1948 = vsyncpa [#allocation13], 1 }
 0xa87   :  { %1950 = vsyncpa [#allocation13 + $0x1], 1 }
 0xa88   :  { %1951 = vsyncpa [#allocation5], 1 }
 0xa89   :  { %1953 = vsyncpa [#allocation5 + $0x1], 1 }

</bundles_post_ra>
